<compile_context>
chip_gen: v5e
topology: v5e:2x2
jax: 0.10.0
libtpu: 0.0.40
codegen_flags: <defaults>
</compile_context>

<pallas_src>
import functools

import jax
import jax.numpy as jnp
from jax import lax
from jax.experimental import pallas as pl
from jax.experimental.pallas import tpu as pltpu


def _round_up(x, m):
    return (x + m - 1) // m * m


def _linear_ln_kernel(x_ref, w_ref, p_ref, o_ref, acc_ref, *, eps, n_valid, inv_n):
    """Fused (x @ W^T + b) -> LayerNorm over the feature axis.

    x_ref:   (TM, TK)          input row/K tile
    w_ref:   (TK, Cp)          weight K tile (transposed to (in, out), padded)
    p_ref:   (3, Cp)  f32      packed [bias; gamma; beta]
    o_ref:   (TM, Cp)          output tile
    acc_ref: (TM, Cp) f32      matmul accumulator, resident across the K grid axis
    """
    k = pl.program_id(1)
    nk = pl.num_programs(1)

    @pl.when(k == 0)
    def _():
        acc_ref[...] = jnp.zeros_like(acc_ref)

    acc_ref[...] += jnp.dot(x_ref[...], w_ref[...],
                            preferred_element_type=jnp.float32)

    @pl.when(k == nk - 1)
    def _():
        y = acc_ref[...] + p_ref[0:1, :]                 # + bias (broadcast over rows)
        cp = y.shape[-1]
        padded = cp != n_valid
        if padded:
            lane = lax.broadcasted_iota(jnp.int32, y.shape, 1)
            valid = lane < n_valid
            y = jnp.where(valid, y, 0.0)

        # LayerNorm, biased variance (PyTorch default). inv_n is a compile-time
        # constant so the "divide" is a free multiply; rsqrt goes to the EUP slot.
        mean = jnp.sum(y, axis=-1, keepdims=True) * inv_n
        centered = y - mean
        sq = centered * centered
        if padded:
            sq = jnp.where(valid, sq, 0.0)
        var = jnp.sum(sq, axis=-1, keepdims=True) * inv_n
        inv = lax.rsqrt(var + eps)

        out = centered * inv * p_ref[1:2, :] + p_ref[2:3, :]
        o_ref[...] = out.astype(o_ref.dtype)


def linear_layer_forward(x, weight, bias, gamma, beta, *,
                         eps=1e-5, tm=256, tk=512, compute_dtype=None):
    """x: [..., C_in]; weight: [C_out, C_in] (PyTorch layout); bias/gamma/beta: [C_out].

    compute_dtype: e.g. jnp.bfloat16 on v6e/v7x for the matmul inputs; accumulation
    and LayerNorm always run in f32. Defaults to x.dtype.
    """
    orig_shape = x.shape
    c_in = orig_shape[-1]
    c_out, c_in_w = weight.shape
    assert c_in_w == c_in, "weight must be [C_out, C_in]"
    assert tk % 128 == 0, "tk must be a multiple of 128"

    out_dtype = x.dtype
    if compute_dtype is None:
        compute_dtype = x.dtype

    x2d = x.reshape(-1, c_in)
    m = x2d.shape[0]

    # ---- tile sizing --------------------------------------------------------
    itemsize = jnp.dtype(compute_dtype).itemsize
    sub = {4: 8, 2: 16, 1: 32}.get(itemsize, 8)          # sublane multiple
    tm_eff = min(_round_up(tm, sub), _round_up(m, sub))
    m_pad = _round_up(m, tm_eff)

    if c_in <= tk:
        tk_eff = c_in                                    # single K step, full-dim block
        c_in_pad = c_in
    else:
        tk_eff = tk
        c_in_pad = _round_up(c_in, tk_eff)

    c_out_pad = _round_up(c_out, 128)                    # lane-dense output stores

    num_m = m_pad // tm_eff
    num_k = c_in_pad // tk_eff

    # ---- pad + cast operands ------------------------------------------------
    xp = x2d
    if (m_pad, c_in_pad) != (m, c_in):
        xp = jnp.pad(xp, ((0, m_pad - m), (0, c_in_pad - c_in)))
    xp = xp.astype(compute_dtype)

    wt = weight.T                                        # (C_in, C_out)
    if (c_in_pad, c_out_pad) != (c_in, c_out):
        wt = jnp.pad(wt, ((0, c_in_pad - c_in), (0, c_out_pad - c_out)))
    wt = wt.astype(compute_dtype)

    params = jnp.stack([bias, gamma, beta]).astype(jnp.float32)   # (3, C_out)
    if c_out_pad != c_out:
        params = jnp.pad(params, ((0, 0), (0, c_out_pad - c_out)))

    # ---- VMEM budget (double-buffered pipelined operands + resident scratch) -
    out_itemsize = jnp.dtype(out_dtype).itemsize
    x_blk = tm_eff * tk_eff * itemsize
    w_blk = tk_eff * c_out_pad * itemsize
    p_blk = 3 * c_out_pad * 4
    o_blk = tm_eff * c_out_pad * out_itemsize
    acc_b = tm_eff * c_out_pad * 4
    vmem_limit = 2 * (x_blk + w_blk + p_blk + o_blk) + acc_b + (2 << 20)
    vmem_limit = int(min(max(vmem_limit, 16 << 20), 64 << 20))   # portable up to v7x

    kernel = functools.partial(_linear_ln_kernel,
                               eps=float(eps),
                               n_valid=c_out,
                               inv_n=1.0 / c_out)

    out = pl.pallas_call(
        kernel,
        out_shape=jax.ShapeDtypeStruct((m_pad, c_out_pad), out_dtype),
        grid_spec=pltpu.PrefetchScalarGridSpec(
            num_scalar_prefetch=0,
            grid=(num_m, num_k),                         # reduction (K) axis last
            in_specs=[
                pl.BlockSpec((tm_eff, tk_eff), lambda i, k: (i, k)),    # x tile
                pl.BlockSpec((tk_eff, c_out_pad), lambda i, k: (k, 0)),  # weight K tile
                pl.BlockSpec((3, c_out_pad), lambda i, k: (0, 0)),       # bias/gamma/beta
            ],
            out_specs=pl.BlockSpec((tm_eff, c_out_pad), lambda i, k: (i, 0)),
            scratch_shapes=[pltpu.VMEM((tm_eff, c_out_pad), jnp.float32)],
        ),
        compiler_params=pltpu.CompilerParams(
            dimension_semantics=("parallel", "arbitrary"),
            vmem_limit_bytes=vmem_limit,
        ),
    )(xp, wt, params)

    out = out[:m, :c_out]
    return out.reshape(*orig_shape[:-1], c_out)


if __name__ == "__main__":
    # Small shapes consistent with the module (features on the last axis).
    # Chosen so the kernel exercises: multiple M tiles, M-tail padding, K-tiling
    # (tk=128 with C_IN=256 -> 2 K steps), and C_out lane-padding (96 -> 128).
    B, S, C_IN, C_OUT = 2, 160, 256, 96
    EPS = 1e-5

    key = jax.random.PRNGKey(0)
    kx, kw, kb, kg, kbe = jax.random.split(key, 5)

    x = jax.random.normal(kx, (B, S, C_IN), dtype=jnp.float32)

    # nn.Linear init: uniform(-1/sqrt(in), 1/sqrt(in))
    bound = 1.0 / (C_IN ** 0.5)
    weight = jax.random.uniform(kw, (C_OUT, C_IN), minval=-bound, maxval=bound,
                                dtype=jnp.float32)
    bias = jax.random.uniform(kb, (C_OUT,), minval=-bound, maxval=bound,
                              dtype=jnp.float32)
    # Use non-trivial LN affine params to actually test them.
    gamma = 1.0 + 0.1 * jax.random.normal(kg, (C_OUT,), dtype=jnp.float32)
    beta = 0.1 * jax.random.normal(kbe, (C_OUT,), dtype=jnp.float32)

    out = linear_layer_forward(x, weight, bias, gamma, beta,
                               eps=EPS, tm=256, tk=128)
    out = jax.block_until_ready(out)

    # Pure-JAX reference (matches PyTorch: biased variance, eps inside sqrt).
    y_ref = x @ weight.T + bias
    mu = y_ref.mean(axis=-1, keepdims=True)
    var = ((y_ref - mu) ** 2).mean(axis=-1, keepdims=True)
    ref = (y_ref - mu) / jnp.sqrt(var + EPS) * gamma + beta

    assert out.shape == (B, S, C_OUT)
    assert jnp.allclose(out, ref, atol=1e-3, rtol=1e-3), (
        float(jnp.max(jnp.abs(out - ref))))

    print("KERNEL_OK")
</pallas_src>

<mosaic_0001>
module attributes {stable_mosaic.version = 11 : i64} {
  func.func @_linear_ln_kernel(%arg0: i32, %arg1: i32, %arg2: memref<256x128xf32, #tpu.memory_space<vmem>>, %arg3: memref<128x128xf32, #tpu.memory_space<vmem>>, %arg4: memref<3x128xf32, #tpu.memory_space<vmem>>, %arg5: memref<256x128xf32, #tpu.memory_space<vmem>>, %arg6: memref<256x128xf32, #tpu.memory_space<vmem>>) attributes {dimension_semantics = [#tpu.dimension_semantics<parallel>, #tpu.dimension_semantics<arbitrary>], iteration_bounds = array<i64: 2, 2>, scalar_prefetch = 0 : i64, scratch_operands = 1 : i64, tpu.core_type = #tpu.core_type<tc>, window_params = [{transform_indices = @transform_0, window_bounds = array<i64: 256, 128>}, {transform_indices = @transform_1, window_bounds = array<i64: 128, 128>}, {pipeline_mode = #tpu.pipeline_mode<synchronous>, transform_indices = @transform_2, window_bounds = array<i64: 3, 128>}, {transform_indices = @transform_3, window_bounds = array<i64: 256, 128>}]} {
    %c0_i32 = arith.constant 0 : i32
    %0 = arith.cmpi eq, %arg1, %c0_i32 : i32
    %1 = arith.extui %0 : i1 to i32
    %c0_i32_0 = arith.constant 0 : i32
    %2 = arith.cmpi ne, %1, %c0_i32_0 : i32
    scf.if %2 {
      %cst_9 = arith.constant 0.000000e+00 : f32
      %12 = vector.broadcast %cst_9 : f32 to vector<256x128xf32>
      %c0_10 = arith.constant 0 : index
      %c0_11 = arith.constant 0 : index
      %13 = vector.load %arg6[%c0_10, %c0_11] : memref<256x128xf32, #tpu.memory_space<vmem>>, vector<256x128xf32>
      tpu.vector_store %arg6[%c0_10, %c0_11], %12 {strides = array<i32>} : memref<256x128xf32, #tpu.memory_space<vmem>>, vector<256x128xf32>,
    } else {
    }
    %c0 = arith.constant 0 : index
    %c0_1 = arith.constant 0 : index
    %3 = vector.load %arg6[%c0, %c0_1] : memref<256x128xf32, #tpu.memory_space<vmem>>, vector<256x128xf32>
    %c0_2 = arith.constant 0 : index
    %c0_3 = arith.constant 0 : index
    %4 = vector.load %arg2[%c0_2, %c0_3] : memref<256x128xf32, #tpu.memory_space<vmem>>, vector<256x128xf32>
    %c0_4 = arith.constant 0 : index
    %c0_5 = arith.constant 0 : index
    %5 = vector.load %arg3[%c0_4, %c0_5] : memref<128x128xf32, #tpu.memory_space<vmem>>, vector<128x128xf32>
    %cst = arith.constant dense<0.000000e+00> : vector<256x128xf32>
    %6 = tpu.matmul %4, %5, %cst {dimension_numbers = #tpu.dot_dimension_numbers<[1], [0], [0], [1], [0, 0, 1, 1], [], []>} : vector<256x128xf32>, vector<128x128xf32>, vector<256x128xf32> -> vector<256x128xf32>
    %7 = arith.addf %3, %6 : vector<256x128xf32>
    %c0_6 = arith.constant 0 : index
    %c0_7 = arith.constant 0 : index
    %8 = vector.load %arg6[%c0_6, %c0_7] : memref<256x128xf32, #tpu.memory_space<vmem>>, vector<256x128xf32>
    tpu.vector_store %arg6[%c0_6, %c0_7], %7 {strides = array<i32>} : memref<256x128xf32, #tpu.memory_space<vmem>>, vector<256x128xf32>,
    %c1_i32 = arith.constant 1 : i32
    %9 = arith.cmpi eq, %arg1, %c1_i32 : i32
    %10 = arith.extui %9 : i1 to i32
    %c0_i32_8 = arith.constant 0 : i32
    %11 = arith.cmpi ne, %10, %c0_i32_8 : i32
    scf.if %11 {
      %c0_9 = arith.constant 0 : index
      %c0_10 = arith.constant 0 : index
      %12 = vector.load %arg6[%c0_9, %c0_10] : memref<256x128xf32, #tpu.memory_space<vmem>>, vector<256x128xf32>
      %c0_11 = arith.constant 0 : index
      %c0_12 = arith.constant 0 : index
      %13 = vector.load %arg4[%c0_11, %c0_12] : memref<3x128xf32, #tpu.memory_space<vmem>>, vector<1x128xf32>
      %14 = vector.broadcast %13 : vector<1x128xf32> to vector<256x128xf32>
      %15 = arith.addf %12, %14 : vector<256x128xf32>
      %16 = tpu.iota {dimensions = array<i32: 1>} : vector<256x128xi32>
      %c96_i32 = arith.constant 96 : i32
      %17 = vector.broadcast %c96_i32 : i32 to vector<256x128xi32>
      %18 = arith.cmpi slt, %16, %17 : vector<256x128xi32>
      %cst_13 = arith.constant 0.000000e+00 : f32
      %19 = vector.broadcast %cst_13 : f32 to vector<256x128xf32>
      %20 = arith.select %18, %15, %19 : vector<256x128xi1>, vector<256x128xf32>
      %cst_14 = arith.constant dense<0.000000e+00> : vector<256xf32>
      %21 = vector.multi_reduction <add>, %20, %cst_14 [1] : vector<256x128xf32> to vector<256xf32>
      %22 = vector.shape_cast %21 : vector<256xf32> to vector<256x1xf32>
      %cst_15 = arith.constant 0.010416667 : f32
      %23 = vector.broadcast %cst_15 : f32 to vector<256x1xf32>
      %24 = arith.mulf %22, %23 : vector<256x1xf32>
      %25 = vector.broadcast %24 : vector<256x1xf32> to vector<256x128xf32>
      %26 = arith.subf %20, %25 : vector<256x128xf32>
      %27 = arith.mulf %26, %26 : vector<256x128xf32>
      %cst_16 = arith.constant 0.000000e+00 : f32
      %28 = vector.broadcast %cst_16 : f32 to vector<256x128xf32>
      %29 = arith.select %18, %27, %28 : vector<256x128xi1>, vector<256x128xf32>
      %cst_17 = arith.constant dense<0.000000e+00> : vector<256xf32>
      %30 = vector.multi_reduction <add>, %29, %cst_17 [1] : vector<256x128xf32> to vector<256xf32>
      %31 = vector.shape_cast %30 : vector<256xf32> to vector<256x1xf32>
      %cst_18 = arith.constant 0.010416667 : f32
      %32 = vector.broadcast %cst_18 : f32 to vector<256x1xf32>
      %33 = arith.mulf %31, %32 : vector<256x1xf32>
      %cst_19 = arith.constant 9.99999974E-6 : f32
      %34 = vector.broadcast %cst_19 : f32 to vector<256x1xf32>
      %35 = arith.addf %33, %34 : vector<256x1xf32>
      %36 = math.rsqrt %35 : vector<256x1xf32>
      %37 = vector.broadcast %36 : vector<256x1xf32> to vector<256x128xf32>
      %38 = arith.mulf %26, %37 : vector<256x128xf32>
      %c1 = arith.constant 1 : index
      %c0_20 = arith.constant 0 : index
      %39 = vector.load %arg4[%c1, %c0_20] : memref<3x128xf32, #tpu.memory_space<vmem>>, vector<1x128xf32>
      %40 = vector.broadcast %39 : vector<1x128xf32> to vector<256x128xf32>
      %41 = arith.mulf %38, %40 : vector<256x128xf32>
      %c2 = arith.constant 2 : index
      %c0_21 = arith.constant 0 : index
      %42 = vector.load %arg4[%c2, %c0_21] : memref<3x128xf32, #tpu.memory_space<vmem>>, vector<1x128xf32>
      %43 = vector.broadcast %42 : vector<1x128xf32> to vector<256x128xf32>
      %44 = arith.addf %41, %43 : vector<256x128xf32>
      %c0_22 = arith.constant 0 : index
      %c0_23 = arith.constant 0 : index
      %45 = vector.load %arg5[%c0_22, %c0_23] : memref<256x128xf32, #tpu.memory_space<vmem>>, vector<256x128xf32>
      tpu.vector_store %arg5[%c0_22, %c0_23], %44 {strides = array<i32>} : memref<256x128xf32, #tpu.memory_space<vmem>>, vector<256x128xf32>,
    } else {
    }
    return
  }
  func.func @transform_0(%arg0: i32, %arg1: i32) -> (i32, i32) {
    %c0_i32 = arith.constant 0 : i32
    return %arg0, %arg1 : i32, i32
  }
  func.func @transform_1(%arg0: i32, %arg1: i32) -> (i32, i32) {
    %c0_i32 = arith.constant 0 : i32
    %c0_i32_0 = arith.constant 0 : i32
    return %arg1, %c0_i32 : i32, i32
  }
  func.func @transform_2(%arg0: i32, %arg1: i32) -> (i32, i32) {
    %c0_i32 = arith.constant 0 : i32
    %c0_i32_0 = arith.constant 0 : i32
    %c0_i32_1 = arith.constant 0 : i32
    return %c0_i32, %c0_i32_0 : i32, i32
  }
  func.func @transform_3(%arg0: i32, %arg1: i32) -> (i32, i32) {
    %c0_i32 = arith.constant 0 : i32
    %c0_i32_0 = arith.constant 0 : i32
    return %arg0, %c0_i32 : i32, i32
  }
}

</mosaic_0001>

<bundles_post_ra>
// kernel: tpu_custom_call.1
= control target key start
LH: loop header
LB: loop body
LE: loop exit
PB: predicated region body
PF: predicated region fallthrough
CT: control target
= control target key end

     0   :  { %s3414_s0 = inlined_call_operand.hbm [shape: f32[512,256], index: 0, kind: input, shape index: {}]   ;;  %s3415_s1 = inlined_call_operand.hbm [shape: f32[256,128], index: 1, kind: input, shape index: {}]   ;;  %s3416_s2 = inlined_call_operand.hbm [shape: f32[3,128], index: 2, kind: input, shape index: {}]   ;;  %s3417_s3 = inlined_call_operand.hbm [shape: f32[512,128], index: 3, kind: output, shape index: {}]  }
   0x1   :  { %3428 = sst [smem:[#allocation25_spill]] %s3414_s0 }
   0x2   :  { %3429 = sst [smem:[#allocation26_spill]] %s3416_s2 }
   0x3   :  { %3430 = sst [smem:[#allocation27_spill]] %s3417_s3 }
   0x4   :  { %8 = vsyncpa [#allocation4], 0 }
   0x5   :  { %10 = vsyncpa [#allocation4 + $0x1], 0 }
   0x6   :  { %11 = vsyncpa [#allocation7], 0 }
   0x7   :  { %13 = vsyncpa [#allocation7 + $0x1], 0 }
   0x8   :  { %14 = vsyncpa [#allocation5], 0 }
   0x9   :  { %16 = vsyncpa [#allocation5 + $0x1], 0  ;;  %s2135_s12 = smov 0   ;;  %s2137_s13 = smov 0  }
   0xa   :  { %s2139_s14 = smov 0   ;;  %s2141_s15 = smov 0  }
   0xb   :  { %s2143_s16 = smov 0   ;;  %s2145_s17 = smov 0  }
   0xc   :  { %s2147_s18 = smov 0   ;;  %s2149_s19 = smov 0  }
   0xd   :  { %s2151_s20 = smov 0   ;;  %s2153_s21 = smov 0  }
   0xe   :  { %s2155_s22 = smov 0   ;;  %s2157_s23 = smov 0  }
   0xf   :  { %s2159_s24 = smov 0   ;;  %s2161_s25 = smov 0  }
  0x10 LB: > { %3431 = sst [smem:[#allocation14_spill]] %s2054_s12  ;;  %s2202_s26 = sadd.s32 4294967295, %s2106_s25   ;;  %s2106_s25 = sphi %s2161_s25, %s22_s25   ;;  %s2102_s24 = sphi %s2159_s24, %s3492_s24   ;;  %s2098_s23 = sphi %s2157_s23, %s3491_s23   ;;  %s2094_s22 = sphi %s2155_s22, %s3479_s22   ;;  %s2090_s21 = sphi %s2153_s21, %s3490_s21   ;;  %s2086_s20 = sphi %s2151_s20, %s3478_s20   ;;  %s2082_s19 = sphi %s2149_s19, %s3489_s19   ;;  %s2078_s18 = sphi %s2147_s18, %s3488_s18   ;;  %s2074_s17 = sphi %s2145_s17, %s3487_s17   ;;  %s2070_s16 = sphi %s2143_s16, %s3486_s16   ;;  %s2066_s15 = sphi %s2141_s15, %s3485_s15   ;;  %s2062_s14 = sphi %s2139_s14, %s3476_s14   ;;  %s2058_s13 = sphi %s2137_s13, %s3484_s13   ;;  %s2054_s12 = sphi %s2135_s12, %s3483_s12  }
  0x11   : > { %3432 = sst [smem:[#allocation15_spill]] %s2062_s14  ;;  %s1571_s27 = sadd.s32 4294967294, %s2106_s25  }
  0x12   : > { %3433 = sst [smem:[#allocation16_spill]] %s2086_s20  ;;  %p56_p0 = scmp.ne.s32.totalorder %s2082_s19, %s2078_s18 }
  0x13   : > { %3434 = sst [smem:[#allocation17_spill]] %s2094_s22  ;;  %p57_p1 = scmp.eq.s32.totalorder %s2202_s26, 0 }
  0x14   : > { %3435 = sst [smem:[#allocation18_spill]] %s2102_s24  ;;  %p82_p2 = scmp.ne.s32.totalorder %s2070_s16, %s2066_s15 }
  0x15   : > { %p2211_p3 = por %p57_p1, %p56_p0  ;;  %p126_p4 = scmp.ne.s32.totalorder %s2062_s14, %s2058_s13 }
  0x16   : > { %p2219_p5 = por %p82_p2, %p57_p1  ;;  %p127_p6 = scmp.eq.s32.totalorder %s2202_s26, 3 }
  0x17   : > { %p132_p7 = scmp.ne.s32.totalorder %s2058_s13, %s2054_s12  ;;  %p133_p8 = scmp.eq.s32.totalorder %s1571_s27, 3 }
  0x18   : > { %p2226_p9 = por %p127_p6, %p126_p4  ;;  %p1572_p10 = scmp.ge.s32.totalorder %s2106_s25, 1 }
  0x19   : > { %p2231_p11 = por %p133_p8, %p132_p7  ;;  %p140_p12 = scmp.lt.s32.totalorder %s2106_s25, 5 }
  0x1a   : > { %s3438_s4 = scalar_select %p2226_p9, 1, 0 }
  0x1b   : > { %s3440_s5 = scalar_select %p2231_p11, 1, 0 }
  0x1c   : > { %3439 = sst [smem:[#allocation19_spill]] %s3438_s4  ;;  %p2239_p13 = pnand %p1572_p10, %p140_p12 }
  0x1d   : > { %3441 = sst [smem:[#allocation20_spill]] %s3440_s5  ;;  %s2108_s10 = smov [#allocation8]  }
  0x1e   : > { %s3442_s2 = sld [smem:[#allocation26_spill]]  ;;  %p1655_p0 = pneg %p2239_p13 }
  0x1f   : > { %s154_s11 = sshll.u32 %s2108_s10, 4  ;;  %s31_s15 = sadd.s32 1, %s2098_s23  ;;  %s155_s11 = int_to_ptr.vmem [resolvable:$true] %s154_s11 }
  0x20   : > { %p1656_p2 = pnand %p1655_p0, %p57_p1  ;;  %p32_p4 = scmp.ge.s32.totalorder %s31_s15, 2 }
  0x21   : > { %s34_s18 = sadd.s32 1, %s2102_s24  ;;  %s43_s27 = sadd.s32 1, %s2086_s20 }
  0x22   : > { %p50_p6 = scmp.ne.s32.totalorder %s2086_s20, %s2082_s19  ;;  %s3494_s15 = smov (%p32_p4, %s31_s15), 0 }
  0x23   : > { %3444 = sst [smem:[#allocation21_spill]] %s3494_s15  ;;  %s3496_s18 = smov (!%p32_p4, %s34_s18), %s2102_s24 }
  0x24   : > { %s152_s8 = sshll.u32 %s3442_s2, 4  ;;  %s2257_s6 = ssub.s32 %s2098_s23, %s3494_s15  ;;  %s153_s8 = int_to_ptr.hbm [resolvable:$true] %s152_s8 }
  0x25   : > { %1658 = dma.hbm_to_vmem [thread:$0]  (!%p1656_p2), %s153_s8, 64, %s155_s11, [#allocation7]  }
  0x26   : > { %p51_p7 = scmp.eq.s32.totalorder %s2106_s25, 0  ;;  %p36_p8 = scmp.ge.s32.totalorder %s3496_s18, 2 }
  0x27   : > { %p67_p10 = scmp.eq.s32.totalorder %s2257_s6, 0  ;;  %p1671_p0 = scmp.lt.s32.totalorder %s2106_s25, 4 }
  0x28   : > { %p2263_p12 = por %p51_p7, %p50_p6  ;;  %s3498_s18 = smov (%p36_p8, %s3496_s18), 0 }
  0x29   : > { %3446 = sst [smem:[#allocation22_spill]] %s3498_s18  ;;  %s165_s8 = sand.u32 1, %s2086_s20  }
  0x2a   : > { %s1594_s10 = sshll.u32 %s2102_s24, 6  ;;  %s38_s11 = ssub.s32 %s2102_s24, %s3498_s18 }
  0x2b   : > { %s40_s28 = sor.u32 %s2257_s6, %s38_s11  ;;  %p114_p2 = scmp.eq.s32.totalorder %s38_s11, 0 }
  0x2c   : > { %p41_p4 = scmp.eq.s32.totalorder %s40_s28, 0  ;;  %s1575_s2 = sshll.u32 %s165_s8, 8 }
  0x2d   : > { %s3447_s15 = sadd.s32 1, %s2062_s14  ;;  %s174_s3 = sadd.s32 %s2098_s23, %s1594_s10 }
  0x2e   : > { %s2278_s5 = scalar_select %p114_p2, %s2062_s14, %s3447_s15  }
  0x2f   : > { %s2281_s12 = scalar_select %p41_p4, %s2086_s20, %s43_s27  }
  0x30   : > { %3448 = sst [smem:[#allocation23_spill]] %s2278_s5  ;;  %s1578_s4 = sshll.u32 %s174_s3, 3 }
  0x31   : > { %3449 = sst [smem:[#allocation24_spill]] %s2281_s12  ;;  %s169_s22 = scalar_lea.vmem [#allocation3], %s1575_s2 }
  0x32   : > { %s179_s18 = sshll.u32 %s169_s22, 4  ;;  %s3450_s0 = sld [smem:[#allocation25_spill]]  ;;  %s180_s18 = int_to_ptr.vmem [resolvable:$true] %s179_s18 }
  0x33   : > { %p1660_p6 = pnand %p1671_p0, %p2263_p12  ;;  %s166_s27 = scalar_lea.sflag [#allocation4], %s165_s8 }
  0x34   : > { %s2109_s10 = smov 256   ;;  %s2110_s3 = smov 128  }
  0x35   : > { %s2111_s12 = smov 8   ;;  %s189_s2 = sand.u32 1, %s2106_s25  }
  0x36   : > { %s69_s22 = sadd.s32 1, %s2074_s17  ;;  %p76_p8 = scmp.ne.s32.totalorder %s2074_s17, %s2070_s16 }
  0x37   : > { %s2298_s24 = scalar_select %p67_p10, %s2074_s17, %s69_s22  }
  0x38   : > { %s176_s28 = scalar_lea.hbm %s3450_s0, %s1578_s4  ;;  %p78_p2 = por %p76_p8, %p51_p7 }
  0x39   : > { %s177_s15 = sshll.u32 %s176_s28, 4  ;;  %s191_s4 = sand.u32 1, %s2074_s17   ;;  %s178_s15 = int_to_ptr.hbm [resolvable:$true] %s177_s15 }
  0x3a   : > { %1662 = dma.hbm_to_vmem [thread:$0]  (!%p1660_p6), %s178_s15, 4096, %s180_s18, %s166_s27, %s2109_s10, %s2110_s3, %s2111_s12  }
  0x3b   : > { %s1595_s11 = sshll.u32 %s2098_s23, 7  ;;  %s1579_s7 = sshll.u32 %s191_s4, 7 }
  0x3c   : > { %s198_s8 = scalar_lea.hbm %s3415_s1, %s1595_s11  ;;  %s193_s5 = scalar_lea.vmem [#allocation6], %s1579_s7 }
  0x3d   : > { %s199_s20 = sshll.u32 %s198_s8, 4  ;;  %s201_s14 = sshll.u32 %s193_s5, 4  ;;  %s200_s20 = int_to_ptr.hbm [resolvable:$true] %s199_s20  ;;  %s202_s14 = int_to_ptr.vmem [resolvable:$true] %s201_s14 }
  0x3e   : > { %p1663_p12 = pnand %p1671_p0, %p78_p2  ;;  %s190_s18 = scalar_lea.sflag [#allocation7], %s189_s2 }
  0x3f   : > { %213 = sbr.rel (%p2239_p13) target bundleno = 743 (0x2e7), region = 32  ;;  %s215_s6 = sand.u32 (!%p2239_p13), 1, %s2082_s19  }
  0x40   : > { %1665 = dma.hbm_to_vmem [thread:$0]  (!%p1663_p12), %s200_s20, 2048, %s202_s14, %s190_s18, %s2110_s3, %s2110_s3, %s2111_s12  }
  0x41   : > { %s1583_s15 = sshll.u32 (!%p2239_p13), %s215_s6, 8  ;;  %s216_s27 = scalar_lea.sflag (!%p2239_p13), [#allocation4], %s215_s6 }
  0x42   : > { %s2312_s10 = scalar_lea.vmem (!%p2239_p13), [#allocation3], %s1583_s15 }
  0x44   : > { %2037 = dma.done.wait (%p2211_p3), %s216_s27, 4096  }
  0x45   : > { %2039 = vsyncadd (%p2211_p3), %s216_s27, 4294963200  ;;  %s225_s0 = sand.u32 1, %s2202_s26   ;;  %s227_s12 = sand.u32 1, %s2070_s16  }
  0x46   : > { %s1584_s14 = sshll.u32 %s227_s12, 7  ;;  %s226_s20 = scalar_lea.sflag [#allocation7], %s225_s0 }
  0x47   : > { %s2320_s5 = scalar_lea.vmem [#allocation6], %s1584_s14 }
  0x48   : > { %2041 = dma.done.wait (%p2219_p5), %s226_s20, 2048  }
  0x49   : > { %2043 = vsyncadd (%p2219_p5), %s226_s20, 4294965248 }
  0x4a   : > { %2045 = dma.done.wait (%p57_p1), [#allocation7], 64  }
  0x4b   : > { %2047 = vsyncadd (%p57_p1), [#allocation7], 4294967232  ;;  %s260_s29 = sand.u32 1, %s2058_s13   ;;  %p1587_p3 = scmp.ne.s32.totalorder %s2090_s21, 0 }
  0x4c   : > { %s1586_s9 = sshll.u32 %s260_s29, 8 }
  0x4d   : > { %s2333_s3 = scalar_lea.vmem [#allocation9], %s1586_s9  ;;  %269 = sbr.rel (%p1587_p3) target bundleno = 115 (0x73), region = 48 }
  0x52   : > { %v2112_v0 = vmov 0.0  }
  0x53   : > { %270 = vst [vmem:[#allocation2 + $0xb0] sm:$0xff] %v2112_v0 }
  0x54   : > { %271 = vst [vmem:[#allocation2] sm:$0xff] %v2112_v0 }
  0x55   : > { %272 = vst [vmem:[#allocation2 + $0xd8] sm:$0xff] %v2112_v0 }
  0x56   : > { %273 = vst [vmem:[#allocation2 + $0x18] sm:$0xff] %v2112_v0 }
  0x57   : > { %274 = vst [vmem:[#allocation2 + $0x50] sm:$0xff] %v2112_v0 }
  0x58   : > { %275 = vst [vmem:[#allocation2 + $0x68] sm:$0xff] %v2112_v0 }
  0x59   : > { %276 = vst [vmem:[#allocation2 + $0x30] sm:$0xff] %v2112_v0 }
  0x5a   : > { %277 = vst [vmem:[#allocation2 + $0x48] sm:$0xff] %v2112_v0 }
  0x5b   : > { %278 = vst [vmem:[#allocation2 + $0x80] sm:$0xff] %v2112_v0 }
  0x5c   : > { %279 = vst [vmem:[#allocation2 + $0x88] sm:$0xff] %v2112_v0 }
  0x5d   : > { %280 = vst [vmem:[#allocation2 + $0xe8] sm:$0xff] %v2112_v0 }
  0x5e   : > { %281 = vst [vmem:[#allocation2 + $0xb8] sm:$0xff] %v2112_v0 }
  0x5f   : > { %282 = vst [vmem:[#allocation2 + $0x60] sm:$0xff] %v2112_v0 }
  0x60   : > { %283 = vst [vmem:[#allocation2 + $0xf0] sm:$0xff] %v2112_v0 }
  0x61   : > { %284 = vst [vmem:[#allocation2 + $0x8] sm:$0xff] %v2112_v0 }
  0x62   : > { %285 = vst [vmem:[#allocation2 + $0x78] sm:$0xff] %v2112_v0 }
  0x63   : > { %286 = vst [vmem:[#allocation2 + $0x38] sm:$0xff] %v2112_v0 }
  0x64   : > { %287 = vst [vmem:[#allocation2 + $0x58] sm:$0xff] %v2112_v0 }
  0x65   : > { %288 = vst [vmem:[#allocation2 + $0x40] sm:$0xff] %v2112_v0 }
  0x66   : > { %289 = vst [vmem:[#allocation2 + $0xc8] sm:$0xff] %v2112_v0 }
  0x67   : > { %290 = vst [vmem:[#allocation2 + $0xe0] sm:$0xff] %v2112_v0 }
  0x68   : > { %291 = vst [vmem:[#allocation2 + $0x90] sm:$0xff] %v2112_v0 }
  0x69   : > { %292 = vst [vmem:[#allocation2 + $0x70] sm:$0xff] %v2112_v0 }
  0x6a   : > { %293 = vst [vmem:[#allocation2 + $0xc0] sm:$0xff] %v2112_v0 }
  0x6b   : > { %294 = vst [vmem:[#allocation2 + $0xa8] sm:$0xff] %v2112_v0 }
  0x6c   : > { %295 = vst [vmem:[#allocation2 + $0xd0] sm:$0xff] %v2112_v0 }
  0x6d   : > { %296 = vst [vmem:[#allocation2 + $0x10] sm:$0xff] %v2112_v0 }
  0x6e   : > { %297 = vst [vmem:[#allocation2 + $0x28] sm:$0xff] %v2112_v0 }
  0x6f   : > { %298 = vst [vmem:[#allocation2 + $0xa0] sm:$0xff] %v2112_v0 }
  0x70   : > { %299 = vst [vmem:[#allocation2 + $0xf8] sm:$0xff] %v2112_v0 }
  0x71   : > { %300 = vst [vmem:[#allocation2 + $0x20] sm:$0xff] %v2112_v0 }
  0x72   : > { %301 = vst [vmem:[#allocation2 + $0x98] sm:$0xff] %v2112_v0 }
  0x73 PF: > { %v381_v1 = vld [vmem:[%s2320_s5 + $0x78] sm:$0xff]  ;;  %v380_v2 = vld [vmem:[%s2320_s5 + $0x70] sm:$0xff]  ;;  %v379_v3 = vld [vmem:[%s2320_s5 + $0x68] sm:$0xff]  ;;  %p1588_p1 = scmp.ne.s32.totalorder %s2090_s21, 1 }
  0x74   : > { %1598 = vmatpush.msra.mxu2 %v381_v1  ;;  %1599 = vmatpush.msra.mxu3 %v381_v1  ;;  %v378_v4 = vld [vmem:[%s2320_s5 + $0x60] sm:$0xff]  ;;  %v377_v5 = vld [vmem:[%s2320_s5 + $0x58] sm:$0xff]  ;;  %v376_v6 = vld [vmem:[%s2320_s5 + $0x50] sm:$0xff] }
  0x75   : > { %382 = vmatpush.msra.mxu0 %v381_v1  ;;  %1597 = vmatpush.msra.mxu1 %v381_v1  ;;  %v375_v7 = vld [vmem:[%s2320_s5 + $0x48] sm:$0xff]  ;;  %v374_v8 = vld [vmem:[%s2320_s5 + $0x40] sm:$0xff]  ;;  %v373_v9 = vld [vmem:[%s2320_s5 + $0x38] sm:$0xff] }
  0x76   : > { %1601 = vmatpush.msra.mxu2 %v380_v2  ;;  %1602 = vmatpush.msra.mxu3 %v380_v2  ;;  %v372_v10 = vld [vmem:[%s2320_s5 + $0x30] sm:$0xff]  ;;  %v371_v11 = vld [vmem:[%s2320_s5 + $0x28] sm:$0xff]  ;;  %v370_v12 = vld [vmem:[%s2320_s5 + $0x20] sm:$0xff] }
  0x77   : > { %383 = vmatpush.msra.mxu0 %v380_v2  ;;  %1600 = vmatpush.msra.mxu1 %v380_v2  ;;  %v369_v13 = vld [vmem:[%s2320_s5 + $0x18] sm:$0xff]  ;;  %v368_v14 = vld [vmem:[%s2320_s5 + $0x10] sm:$0xff]  ;;  %v367_v15 = vld [vmem:[%s2320_s5 + $0x8] sm:$0xff] }
  0x78   : > { %1604 = vmatpush.msra.mxu2 %v379_v3  ;;  %1605 = vmatpush.msra.mxu3 %v379_v3  ;;  %v366_v16 = vld [vmem:[%s2320_s5] sm:$0xff]  ;;  %v351_v21 = vld [vmem:[%s2312_s10 + $0x88] sm:$0xff]  ;;  %v352_v25 = vld [vmem:[%s2312_s10 + $0x90] sm:$0xff] }
  0x79   : > { %384 = vmatpush.msra.mxu0 %v379_v3  ;;  %1603 = vmatpush.msra.mxu1 %v379_v3  ;;  %v350_v17 = vld [vmem:[%s2312_s10 + $0x80] sm:$0xff]  ;;  %v359_v22 = vld [vmem:[%s2312_s10 + $0xc8] sm:$0xff]  ;;  %v360_v26 = vld [vmem:[%s2312_s10 + $0xd0] sm:$0xff] }
  0x7a   : > { %1607 = vmatpush.msra.mxu2 %v378_v4  ;;  %1608 = vmatpush.msra.mxu3 %v378_v4  ;;  %v358_v18 = vld [vmem:[%s2312_s10 + $0xc0] sm:$0xff]  ;;  %v335_v23 = vld [vmem:[%s2312_s10 + $0x8] sm:$0xff]  ;;  %v336_v27 = vld [vmem:[%s2312_s10 + $0x10] sm:$0xff] }
  0x7b   : > { %385 = vmatpush.msra.mxu0 %v378_v4  ;;  %1606 = vmatpush.msra.mxu1 %v378_v4  ;;  %v334_v19 = vld [vmem:[%s2312_s10] sm:$0xff]  ;;  %v343_v24 = vld [vmem:[%s2312_s10 + $0x48] sm:$0xff]  ;;  %v344_v28 = vld [vmem:[%s2312_s10 + $0x50] sm:$0xff] }
  0x7c   : > { %1610 = vmatpush.msra.mxu2 %v377_v5  ;;  %1611 = vmatpush.msra.mxu3 %v377_v5  ;;  %v342_v20 = vld [vmem:[%s2312_s10 + $0x40] sm:$0xff]  ;;  %v353_v29 = vld [vmem:[%s2312_s10 + $0x98] sm:$0xff]  ;;  %v355_v37 = vld [vmem:[%s2312_s10 + $0xa8] sm:$0xff] }
  0x7d   : > { %386 = vmatpush.msra.mxu0 %v377_v5  ;;  %1609 = vmatpush.msra.mxu1 %v377_v5  ;;  %v361_v30 = vld [vmem:[%s2312_s10 + $0xd8] sm:$0xff]  ;;  %v354_v33 = vld [vmem:[%s2312_s10 + $0xa0] sm:$0xff]  ;;  %v363_v38 = vld [vmem:[%s2312_s10 + $0xe8] sm:$0xff] }
  0x7e   : > { %1613 = vmatpush.msra.mxu2 %v376_v6  ;;  %1614 = vmatpush.msra.mxu3 %v376_v6  ;;  %v337_v31 = vld [vmem:[%s2312_s10 + $0x18] sm:$0xff]  ;;  %v362_v34 = vld [vmem:[%s2312_s10 + $0xe0] sm:$0xff]  ;;  %v339_v39 = vld [vmem:[%s2312_s10 + $0x28] sm:$0xff] }
  0x7f   : > { %387 = vmatpush.msra.mxu0 %v376_v6  ;;  %1612 = vmatpush.msra.mxu1 %v376_v6  ;;  %v345_v32 = vld [vmem:[%s2312_s10 + $0x58] sm:$0xff]  ;;  %v338_v35 = vld [vmem:[%s2312_s10 + $0x20] sm:$0xff]  ;;  %v347_v40 = vld [vmem:[%s2312_s10 + $0x68] sm:$0xff] }
  0x80   : > { %1616 = vmatpush.msra.mxu2 %v375_v7  ;;  %1617 = vmatpush.msra.mxu3 %v375_v7  ;;  %v346_v36 = vld [vmem:[%s2312_s10 + $0x60] sm:$0xff]  ;;  %v356_v41 = vld [vmem:[%s2312_s10 + $0xb0] sm:$0xff]  ;;  %v357_v45 = vld [vmem:[%s2312_s10 + $0xb8] sm:$0xff] }
  0x81   : > { %388 = vmatpush.msra.mxu0 %v375_v7  ;;  %1615 = vmatpush.msra.mxu1 %v375_v7  ;;  %v364_v42 = vld [vmem:[%s2312_s10 + $0xf0] sm:$0xff]  ;;  %v365_v46 = vld [vmem:[%s2312_s10 + $0xf8] sm:$0xff]  ;;  %v310_v50 = vld [vmem:[#allocation2 + $0x80] sm:$0xff] }
  0x82   : > { %1619 = vmatpush.msra.mxu2 %v374_v8  ;;  %1620 = vmatpush.msra.mxu3 %v374_v8  ;;  %v340_v43 = vld [vmem:[%s2312_s10 + $0x30] sm:$0xff]  ;;  %v341_v47 = vld [vmem:[%s2312_s10 + $0x38] sm:$0xff]  ;;  %v326_v56 = vld [vmem:[#allocation2 + $0xa8] sm:$0xff] }
  0x83   : > { %389 = vmatpush.msra.mxu0 %v374_v8  ;;  %1618 = vmatpush.msra.mxu1 %v374_v8  ;;  %v348_v44 = vld [vmem:[%s2312_s10 + $0x70] sm:$0xff]  ;;  %v349_v48 = vld [vmem:[%s2312_s10 + $0x78] sm:$0xff]  ;;  %v303_v61 = vld [vmem:[#allocation2] sm:$0xff] }
  0x84   : > { %1622 = vmatpush.msra.mxu2 %v373_v9  ;;  %1623 = vmatpush.msra.mxu3 %v373_v9  ;;  %v302_v49 = vld [vmem:[#allocation2 + $0xb0] sm:$0xff]  ;;  %v318_v55 = vld [vmem:[#allocation2 + $0x38] sm:$0xff]  ;;  %v311_v62 = vld [vmem:[#allocation2 + $0x88] sm:$0xff] }
  0x85   : > { %390 = vmatpush.msra.mxu0 %v373_v9  ;;  %1621 = vmatpush.msra.mxu1 %v373_v9  ;;  %v319_v3 = vld [vmem:[#allocation2 + $0x58] sm:$0xff]  ;;  %v327_v4 = vld [vmem:[#allocation2 + $0xd0] sm:$0xff] }
  0x86   : > { %1625 = vmatpush.msra.mxu2 %v372_v10  ;;  %1626 = vmatpush.msra.mxu3 %v372_v10  ;;  %v304_v9 = vld [vmem:[#allocation2 + $0xd8] sm:$0xff] }
  0x87   : > { %391 = vmatpush.msra.mxu0 %v372_v10  ;;  %1624 = vmatpush.msra.mxu1 %v372_v10  ;;  %v312_v10 = vld [vmem:[#allocation2 + $0xe8] sm:$0xff] }
  0x88   : > { %1628 = vmatpush.msra.mxu2 %v371_v11  ;;  %1629 = vmatpush.msra.mxu3 %v371_v11 }
  0x89   : > { %392 = vmatpush.msra.mxu0 %v371_v11  ;;  %1627 = vmatpush.msra.mxu1 %v371_v11 }
  0x8a   : > { %1631 = vmatpush.msra.mxu2 %v370_v12  ;;  %1632 = vmatpush.msra.mxu3 %v370_v12 }
  0x8b   : > { %393 = vmatpush.msra.mxu0 %v370_v12  ;;  %1630 = vmatpush.msra.mxu1 %v370_v12 }
  0x8c   : > { %1634 = vmatpush.msra.mxu2 %v369_v13  ;;  %1635 = vmatpush.msra.mxu3 %v369_v13 }
  0x8d   : > { %394 = vmatpush.msra.mxu0 %v369_v13  ;;  %1633 = vmatpush.msra.mxu1 %v369_v13 }
  0x8e   : > { %1637 = vmatpush.msra.mxu2 %v368_v14  ;;  %1638 = vmatpush.msra.mxu3 %v368_v14 }
  0x8f   : > { %395 = vmatpush.msra.mxu0 %v368_v14  ;;  %1636 = vmatpush.msra.mxu1 %v368_v14 }
  0x90   : > { %1640 = vmatpush.msra.mxu2 %v367_v15  ;;  %1641 = vmatpush.msra.mxu3 %v367_v15 }
  0x91   : > { %396 = vmatpush.msra.mxu0 %v367_v15  ;;  %1639 = vmatpush.msra.mxu1 %v367_v15  ;;  %v320_v15 = vld [vmem:[#allocation2 + $0x40] sm:$0xff] }
  0x92   : > { %1643 = vmatpush.msra.mxu2 %v366_v16  ;;  %1644 = vmatpush.msra.mxu3 %v366_v16 }
  0x93   : > { %446 = vmatmul.f32.vlgmr.msra.gmra.mxu2 %v350_v17  ;;  %470 = vmatmul.f32.vlgmr.msra.gmra.mxu3 %v358_v18 }
  0x94   : > { %397 = vmatpush.msra.mxu0 %v366_v16  ;;  %1642 = vmatpush.msra.mxu1 %v366_v16  ;;  %v328_v16 = vld [vmem:[#allocation2 + $0x10] sm:$0xff] }
  0x95   : > { %398 = vmatmul.f32.vlgmr.msra.gmra.mxu0 %v334_v19  ;;  %422 = vmatmul.f32.vlgmr.msra.gmra.mxu1 %v342_v20 }
  0x9b   : > { %449 = vmatmul.f32.gmra.mxu2 %v351_v21  ;;  %473 = vmatmul.f32.gmra.mxu3 %v359_v22  ;;  %v305_v21 = vld [vmem:[#allocation2 + $0x18] sm:$0xff] }
  0x9c   : > { %v313_v22 = vld [vmem:[#allocation2 + $0xb8] sm:$0xff] }
  0x9d   : > { %401 = vmatmul.f32.gmra.mxu0 %v335_v23  ;;  %425 = vmatmul.f32.gmra.mxu1 %v343_v24 }
  0xa3   : > { %452 = vmatmul.f32.gmra.mxu2 %v352_v25  ;;  %476 = vmatmul.f32.gmra.mxu3 %v360_v26 }
  0xa5   : > { %404 = vmatmul.f32.gmra.mxu0 %v336_v27  ;;  %428 = vmatmul.f32.gmra.mxu1 %v344_v28  ;;  %v321_v27 = vld [vmem:[#allocation2 + $0xc8] sm:$0xff] }
  0xa6   : > { %v329_v28 = vld [vmem:[#allocation2 + $0x28] sm:$0xff] }
  0xab   : > { %455 = vmatmul.f32.gmra.mxu2 %v353_v29  ;;  %479 = vmatmul.f32.gmra.mxu3 %v361_v30 }
  0xad   : > { %407 = vmatmul.f32.gmra.mxu0 %v337_v31  ;;  %431 = vmatmul.f32.gmra.mxu1 %v345_v32 }
  0xb3   : > { %458 = vmatmul.f32.gmra.mxu2 %v354_v33  ;;  %482 = vmatmul.f32.gmra.mxu3 %v362_v34  ;;  %v306_v33 = vld [vmem:[#allocation2 + $0x50] sm:$0xff]  ;;  %v314_v34 = vld [vmem:[#allocation2 + $0x60] sm:$0xff] }
  0xb5   : > { %410 = vmatmul.f32.gmra.mxu0 %v338_v35  ;;  %434 = vmatmul.f32.gmra.mxu1 %v346_v36 }
  0xbb   : > { %461 = vmatmul.f32.gmra.mxu2 %v355_v37  ;;  %485 = vmatmul.f32.gmra.mxu3 %v363_v38 }
  0xbd   : > { %413 = vmatmul.f32.gmra.mxu0 %v339_v39  ;;  %437 = vmatmul.f32.gmra.mxu1 %v347_v40  ;;  %v322_v39 = vld [vmem:[#allocation2 + $0xe0] sm:$0xff] }
  0xbe   : > { %v330_v40 = vld [vmem:[#allocation2 + $0xa0] sm:$0xff] }
  0xc3   : > { %464 = vmatmul.f32.gmra.mxu2 %v356_v41  ;;  %488 = vmatmul.f32.gmra.mxu3 %v364_v42 }
  0xc5   : > { %416 = vmatmul.f32.gmra.mxu0 %v340_v43  ;;  %440 = vmatmul.f32.gmra.mxu1 %v348_v44 }
  0xcb   : > { %467 = vmatmul.f32.gmra.mxu2 %v357_v45  ;;  %491 = vmatmul.f32.gmra.mxu3 %v365_v46  ;;  %v307_v45 = vld [vmem:[#allocation2 + $0x68] sm:$0xff]  ;;  %v315_v46 = vld [vmem:[#allocation2 + $0xf0] sm:$0xff] }
  0xcd   : > { %419 = vmatmul.f32.gmra.mxu0 %v341_v47  ;;  %443 = vmatmul.f32.gmra.mxu1 %v349_v48 }
 0x112   : > { %v399_v51 = vpop.f32.mrf.mxu0  ;;  %v423_v52 = vpop.f32.mrf.mxu1 }
 0x113   : > { %v495_v53 = vadd.f32 %v399_v51, %v302_v49  ;;  %v503_v54 = vadd.f32 %v423_v52, %v310_v50  ;;  %v323_v51 = vld [vmem:[#allocation2 + $0x90] sm:$0xff]  ;;  %v331_v52 = vld [vmem:[#allocation2 + $0xf8] sm:$0xff] }
 0x115   : > { %527 = vst [vmem:[#allocation2 + $0xb0] sm:$0xff] %v495_v53 }
 0x116   : > { %535 = vst [vmem:[#allocation2 + $0x80] sm:$0xff] %v503_v54  ;;  %v447_v57 = vpop.f32.mrf.mxu2  ;;  %v471_v58 = vpop.f32.mrf.mxu3 }
 0x117   : > { %v511_v59 = vadd.f32 %v447_v57, %v318_v55  ;;  %v519_v60 = vadd.f32 %v471_v58, %v326_v56  ;;  %v308_v57 = vld [vmem:[#allocation2 + $0x30] sm:$0xff]  ;;  %v316_v58 = vld [vmem:[#allocation2 + $0x8] sm:$0xff] }
 0x119   : > { %543 = vst [vmem:[#allocation2 + $0x38] sm:$0xff] %v511_v59 }
 0x11a   : > { %551 = vst [vmem:[#allocation2 + $0xa8] sm:$0xff] %v519_v60  ;;  %v402_v63 = vpop.f32.mrf.mxu0  ;;  %v426_v0 = vpop.f32.mrf.mxu1 }
 0x11b   : > { %v496_v1 = vadd.f32 %v402_v63, %v303_v61  ;;  %v504_v2 = vadd.f32 %v426_v0, %v311_v62  ;;  %v324_v63 = vld [vmem:[#allocation2 + $0x70] sm:$0xff]  ;;  %v332_v0 = vld [vmem:[#allocation2 + $0x20] sm:$0xff] }
 0x11d   : > { %528 = vst [vmem:[#allocation2] sm:$0xff] %v496_v1 }
 0x11e   : > { %536 = vst [vmem:[#allocation2 + $0x88] sm:$0xff] %v504_v2  ;;  %v450_v5 = vpop.f32.mrf.mxu2  ;;  %v474_v6 = vpop.f32.mrf.mxu3 }
 0x11f   : > { %v512_v7 = vadd.f32 %v450_v5, %v319_v3  ;;  %v520_v8 = vadd.f32 %v474_v6, %v327_v4  ;;  %v309_v5 = vld [vmem:[#allocation2 + $0x48] sm:$0xff]  ;;  %v317_v6 = vld [vmem:[#allocation2 + $0x78] sm:$0xff] }
 0x121   : > { %544 = vst [vmem:[#allocation2 + $0x58] sm:$0xff] %v512_v7 }
 0x122   : > { %552 = vst [vmem:[#allocation2 + $0xd0] sm:$0xff] %v520_v8  ;;  %v405_v11 = vpop.f32.mrf.mxu0  ;;  %v429_v12 = vpop.f32.mrf.mxu1 }
 0x123   : > { %v497_v13 = vadd.f32 %v405_v11, %v304_v9  ;;  %v505_v14 = vadd.f32 %v429_v12, %v312_v10  ;;  %v325_v11 = vld [vmem:[#allocation2 + $0xc0] sm:$0xff]  ;;  %v333_v12 = vld [vmem:[#allocation2 + $0x98] sm:$0xff] }
 0x125   : > { %529 = vst [vmem:[#allocation2 + $0xd8] sm:$0xff] %v497_v13 }
 0x126   : > { %537 = vst [vmem:[#allocation2 + $0xe8] sm:$0xff] %v505_v14  ;;  %v453_v17 = vpop.f32.mrf.mxu2  ;;  %v477_v18 = vpop.f32.mrf.mxu3 }
 0x127   : > { %v513_v19 = vadd.f32 %v453_v17, %v320_v15  ;;  %v521_v20 = vadd.f32 %v477_v18, %v328_v16 }
 0x129   : > { %545 = vst [vmem:[#allocation2 + $0x40] sm:$0xff] %v513_v19 }
 0x12a   : > { %553 = vst [vmem:[#allocation2 + $0x10] sm:$0xff] %v521_v20  ;;  %v408_v23 = vpop.f32.mrf.mxu0  ;;  %v432_v24 = vpop.f32.mrf.mxu1 }
 0x12b   : > { %v498_v25 = vadd.f32 %v408_v23, %v305_v21  ;;  %v506_v26 = vadd.f32 %v432_v24, %v313_v22 }
 0x12d   : > { %530 = vst [vmem:[#allocation2 + $0x18] sm:$0xff] %v498_v25 }
 0x12e   : > { %538 = vst [vmem:[#allocation2 + $0xb8] sm:$0xff] %v506_v26  ;;  %v456_v29 = vpop.f32.mrf.mxu2  ;;  %v480_v30 = vpop.f32.mrf.mxu3 }
 0x12f   : > { %v514_v31 = vadd.f32 %v456_v29, %v321_v27  ;;  %v522_v32 = vadd.f32 %v480_v30, %v329_v28 }
 0x131   : > { %546 = vst [vmem:[#allocation2 + $0xc8] sm:$0xff] %v514_v31 }
 0x132   : > { %554 = vst [vmem:[#allocation2 + $0x28] sm:$0xff] %v522_v32  ;;  %v411_v35 = vpop.f32.mrf.mxu0  ;;  %v435_v36 = vpop.f32.mrf.mxu1 }
 0x133   : > { %v499_v37 = vadd.f32 %v411_v35, %v306_v33  ;;  %v507_v38 = vadd.f32 %v435_v36, %v314_v34 }
 0x135   : > { %531 = vst [vmem:[#allocation2 + $0x50] sm:$0xff] %v499_v37 }
 0x136   : > { %539 = vst [vmem:[#allocation2 + $0x60] sm:$0xff] %v507_v38  ;;  %v459_v41 = vpop.f32.mrf.mxu2  ;;  %v483_v42 = vpop.f32.mrf.mxu3 }
 0x137   : > { %v515_v43 = vadd.f32 %v459_v41, %v322_v39  ;;  %v523_v44 = vadd.f32 %v483_v42, %v330_v40 }
 0x139   : > { %547 = vst [vmem:[#allocation2 + $0xe0] sm:$0xff] %v515_v43 }
 0x13a   : > { %555 = vst [vmem:[#allocation2 + $0xa0] sm:$0xff] %v523_v44  ;;  %v414_v47 = vpop.f32.mrf.mxu0  ;;  %v438_v48 = vpop.f32.mrf.mxu1 }
 0x13b   : > { %v500_v49 = vadd.f32 %v414_v47, %v307_v45  ;;  %v508_v50 = vadd.f32 %v438_v48, %v315_v46 }
 0x13d   : > { %532 = vst [vmem:[#allocation2 + $0x68] sm:$0xff] %v500_v49 }
 0x13e   : > { %540 = vst [vmem:[#allocation2 + $0xf0] sm:$0xff] %v508_v50  ;;  %v462_v53 = vpop.f32.mrf.mxu2  ;;  %v486_v54 = vpop.f32.mrf.mxu3 }
 0x13f   : > { %v516_v55 = vadd.f32 %v462_v53, %v323_v51  ;;  %v524_v56 = vadd.f32 %v486_v54, %v331_v52 }
 0x141   : > { %548 = vst [vmem:[#allocation2 + $0x90] sm:$0xff] %v516_v55 }
 0x142   : > { %556 = vst [vmem:[#allocation2 + $0xf8] sm:$0xff] %v524_v56  ;;  %v417_v59 = vpop.f32.mrf.mxu0  ;;  %v441_v60 = vpop.f32.mrf.mxu1 }
 0x143   : > { %v501_v61 = vadd.f32 %v417_v59, %v308_v57  ;;  %v509_v62 = vadd.f32 %v441_v60, %v316_v58 }
 0x145   : > { %533 = vst [vmem:[#allocation2 + $0x30] sm:$0xff] %v501_v61 }
 0x146   : > { %541 = vst [vmem:[#allocation2 + $0x8] sm:$0xff] %v509_v62  ;;  %v465_v1 = vpop.f32.mrf.mxu2  ;;  %v489_v2 = vpop.f32.mrf.mxu3 }
 0x147   : > { %v517_v3 = vadd.f32 %v465_v1, %v324_v63  ;;  %v525_v4 = vadd.f32 %v489_v2, %v332_v0 }
 0x149   : > { %549 = vst [vmem:[#allocation2 + $0x70] sm:$0xff] %v517_v3 }
 0x14a   : > { %557 = vst [vmem:[#allocation2 + $0x20] sm:$0xff] %v525_v4  ;;  %v420_v7 = vpop.f32.mrf.mxu0  ;;  %v444_v8 = vpop.f32.mrf.mxu1 }
 0x14b   : > { %v502_v9 = vadd.f32 %v420_v7, %v309_v5  ;;  %v510_v10 = vadd.f32 %v444_v8, %v317_v6 }
 0x14d   : > { %534 = vst [vmem:[#allocation2 + $0x48] sm:$0xff] %v502_v9 }
 0x14e   : > { %542 = vst [vmem:[#allocation2 + $0x78] sm:$0xff] %v510_v10  ;;  %v468_v13 = vpop.f32.mrf.mxu2  ;;  %v492_v14 = vpop.f32.mrf.mxu3  ;;  %562 = sbr.rel (%p1588_p1) target bundleno = 721 (0x2d1), region = 52 }
 0x14f   : > { %v518_v15 = vadd.f32 %v468_v13, %v325_v11  ;;  %v526_v16 = vadd.f32 %v492_v14, %v333_v12 }
 0x151   : > { %550 = vst [vmem:[#allocation2 + $0xc0] sm:$0xff] %v518_v15 }
 0x152   : > { %558 = vst [vmem:[#allocation2 + $0x98] sm:$0xff] %v526_v16 }
 0x153   : > { %v567_v17 = vld [vmem:[#allocation2 + $0x50] sm:$0xff]  ;;  %v2385_v18 = vld [vmem:[#allocation8] ss:$0 sm:$0xff]  ;;  %v629_v19 = vlaneseq  ;;  %v565_v20 = vld [vmem:[#allocation2 + $0xd8] sm:$0xff] }
 0x154   : > { %v563_v21 = vld [vmem:[#allocation2 + $0xb0] sm:$0xff]  ;;  %v601_v22 = vadd.f32 %v2385_v18, %v567_v17  ;;  %v599_v24 = vadd.f32 %v2385_v18, %v565_v20  ;;  %v568_v26 = vld [vmem:[#allocation2 + $0x68] sm:$0xff]  ;;  %v566_v27 = vld [vmem:[#allocation2 + $0x18] sm:$0xff] }
 0x155   : > { %v2388_v23 = vand.u32 127, %v629_v19  ;;  %v597_v25 = vadd.f32 %v2385_v18, %v563_v21  ;;  %v564_v31 = vld [vmem:[#allocation2] sm:$0xff]  ;;  %v602_v32 = vadd.f32 %v2385_v18, %v568_v26  ;;  %v600_v33 = vadd.f32 %v2385_v18, %v566_v27  ;;  %v570_v39 = vld [vmem:[#allocation2 + $0x48] sm:$0xff]  ;;  %v569_v40 = vld [vmem:[#allocation2 + $0x30] sm:$0xff] }
 0x156   : > { %v598_v34 = vadd.f32 %v2385_v18, %v564_v31  ;;  %v571_v38 = vld [vmem:[#allocation2 + $0x80] sm:$0xff]  ;;  %v604_v42 = vadd.f32 %v2385_v18, %v570_v39  ;;  %v603_v43 = vadd.f32 %v2385_v18, %v569_v40  ;;  %v574_v47 = vld [vmem:[#allocation2 + $0xb8] sm:$0xff]  ;;  %v573_v48 = vld [vmem:[#allocation2 + $0xe8] sm:$0xff] }
 0x157   : > { %vm631_vm0 = vcmp.lt.s32.totalorder %v2388_v23, 96  ;;  %v605_v41 = vadd.f32 %v2385_v18, %v571_v38  ;;  %v572_v49 = vld [vmem:[#allocation2 + $0x88] sm:$0xff]  ;;  %v608_v50 = vadd.f32 %v2385_v18, %v574_v47  ;;  %v607_v51 = vadd.f32 %v2385_v18, %v573_v48  ;;  %v576_v57 = vld [vmem:[#allocation2 + $0xf0] sm:$0xff]  ;;  %v575_v58 = vld [vmem:[#allocation2 + $0x60] sm:$0xff] }
 0x158   : > { %v2395_v28 = vsel %vm631_vm0, %v601_v22, 0.0  ;;  %v2399_v29 = vsel %vm631_vm0, %v599_v24, 0.0  ;;  %v2403_v30 = vsel %vm631_vm0, %v597_v25, 0.0  ;;  %v2413_v35 = vsel %vm631_vm0, %v602_v32, 0.0  ;;  %v577_v56 = vld [vmem:[#allocation2 + $0x8] sm:$0xff]  ;;  %v580_v1 = vld [vmem:[#allocation2 + $0x58] sm:$0xff] }
 0x159   : > { %672 = vadd.xlane.f32.xlu2 %v2395_v28  ;;  %668 = vadd.xlane.f32.xlu1 %v2399_v29  ;;  %v2417_v36 = vsel %vm631_vm0, %v600_v33, 0.0  ;;  %v2421_v37 = vsel %vm631_vm0, %v598_v34, 0.0  ;;  %v2431_v44 = vsel %vm631_vm0, %v605_v41, 0.0  ;;  %v2435_v45 = vsel %vm631_vm0, %v604_v42, 0.0  ;;  %v579_v2 = vld [vmem:[#allocation2 + $0x38] sm:$0xff]  ;;  %v583_v10 = vld [vmem:[#allocation2 + $0xe0] sm:$0xff] }
 0x15a   : > { %664 = vadd.xlane.f32.xlu0 %v2403_v30  ;;  %v2439_v46 = vsel %vm631_vm0, %v603_v43, 0.0  ;;  %v606_v52 = vadd.f32 %v2385_v18, %v572_v49  ;;  %v2449_v53 = vsel %vm631_vm0, %v608_v50, 0.0  ;;  %v2453_v54 = vsel %vm631_vm0, %v607_v51, 0.0  ;;  %v578_v3 = vld [vmem:[#allocation2 + $0x78] sm:$0xff]  ;;  %v582_v11 = vld [vmem:[#allocation2 + $0xc8] sm:$0xff]  ;;  %v581_v12 = vld [vmem:[#allocation2 + $0x40] sm:$0xff] }
 0x15b   : > { %v611_v59 = vadd.f32 %v2385_v18, %v577_v56  ;;  %v610_v60 = vadd.f32 %v2385_v18, %v576_v57  ;;  %v609_v61 = vadd.f32 %v2385_v18, %v575_v58  ;;  %v614_v4 = vadd.f32 %v2385_v18, %v580_v1  ;;  %v586_v20 = vld [vmem:[#allocation2 + $0xc0] sm:$0xff]  ;;  %v585_v21 = vld [vmem:[#allocation2 + $0x70] sm:$0xff]  ;;  %v587_v38 = vld [vmem:[#allocation2 + $0xa8] sm:$0xff] }
 0x15c   : > { %v2457_v55 = vsel %vm631_vm0, %v606_v52, 0.0  ;;  %v613_v5 = vadd.f32 %v2385_v18, %v579_v2  ;;  %v612_v6 = vadd.f32 %v2385_v18, %v578_v3  ;;  %v617_v13 = vadd.f32 %v2385_v18, %v583_v10  ;;  %v584_v22 = vld [vmem:[#allocation2 + $0x90] sm:$0xff]  ;;  %v592_v48 = vld [vmem:[#allocation2 + $0xf8] sm:$0xff]  ;;  %v591_v49 = vld [vmem:[#allocation2 + $0xa0] sm:$0xff] }
 0x15d   : > { %v2467_v62 = vsel %vm631_vm0, %v611_v59, 0.0  ;;  %v2471_v63 = vsel %vm631_vm0, %v610_v60, 0.0  ;;  %v2475_v0 = vsel %vm631_vm0, %v609_v61, 0.0  ;;  %v2485_v7 = vsel %vm631_vm0, %v614_v4, 0.0  ;;  %v589_v33 = vld [vmem:[#allocation2 + $0x10] sm:$0xff]  ;;  %v590_v50 = vld [vmem:[#allocation2 + $0x28] sm:$0xff] }
 0x15e   : > { %v2489_v8 = vsel %vm631_vm0, %v613_v5, 0.0  ;;  %v2493_v9 = vsel %vm631_vm0, %v612_v6, 0.0  ;;  %v616_v14 = vadd.f32 %v2385_v18, %v582_v11  ;;  %v615_v15 = vadd.f32 %v2385_v18, %v581_v12  ;;  %v588_v34 = vld [vmem:[#allocation2 + $0xd0] sm:$0xff]  ;;  %v594_v60 = vld [vmem:[#allocation2 + $0x98] sm:$0xff]  ;;  %v593_v61 = vld [vmem:[#allocation2 + $0x20] sm:$0xff] }
 0x15f   : > { %v2503_v16 = vsel %vm631_vm0, %v617_v13, 0.0  ;;  %v620_v24 = vadd.f32 %v2385_v18, %v586_v20  ;;  %v619_v25 = vadd.f32 %v2385_v18, %v585_v21  ;;  %v618_v26 = vadd.f32 %v2385_v18, %v584_v22 }
 0x160   : > { %v2507_v17 = vsel %vm631_vm0, %v616_v14, 0.0  ;;  %v2511_v19 = vsel %vm631_vm0, %v615_v15, 0.0  ;;  %v623_v39 = vadd.f32 %v2385_v18, %v589_v33  ;;  %v622_v40 = vadd.f32 %v2385_v18, %v588_v34 }
 0x161   : > { %674 = vadd.xlane.f32.xlu2 %v2413_v35  ;;  %670 = vadd.xlane.f32.xlu1 %v2417_v36  ;;  %v2521_v27 = vsel %vm631_vm0, %v620_v24, 0.0  ;;  %v2525_v31 = vsel %vm631_vm0, %v619_v25, 0.0  ;;  %v2529_v32 = vsel %vm631_vm0, %v618_v26, 0.0  ;;  %v621_v41 = vadd.f32 %v2385_v18, %v587_v38 }
 0x162   : > { %666 = vadd.xlane.f32.xlu0 %v2421_v37  ;;  %v2539_v42 = vsel %vm631_vm0, %v623_v39, 0.0  ;;  %v2543_v43 = vsel %vm631_vm0, %v622_v40, 0.0  ;;  %v626_v51 = vadd.f32 %v2385_v18, %v592_v48  ;;  %v625_v52 = vadd.f32 %v2385_v18, %v591_v49 }
 0x163   : > { %v2547_v47 = vsel %vm631_vm0, %v621_v41, 0.0  ;;  %v624_v56 = vadd.f32 %v2385_v18, %v590_v50  ;;  %v628_v1 = vadd.f32 %v2385_v18, %v594_v60  ;;  %v627_v2 = vadd.f32 %v2385_v18, %v593_v61 }
 0x164   : > { %v2557_v57 = vsel %vm631_vm0, %v626_v51, 0.0  ;;  %v2561_v58 = vsel %vm631_vm0, %v625_v52, 0.0 }
 0x165   : > { %v2565_v59 = vsel %vm631_vm0, %v624_v56, 0.0  ;;  %v2574_v3 = vsel %vm631_vm0, %v628_v1, 0.0  ;;  %v2578_v4 = vsel %vm631_vm0, %v627_v2, 0.0 }
 0x169   : > { %680 = vadd.xlane.f32.xlu2 %v2431_v44  ;;  %678 = vadd.xlane.f32.xlu1 %v2435_v45 }
 0x16a   : > { %676 = vadd.xlane.f32.xlu0 %v2439_v46 }
 0x171   : > { %686 = vadd.xlane.f32.xlu2 %v2449_v53  ;;  %684 = vadd.xlane.f32.xlu1 %v2453_v54 }
 0x172   : > { %682 = vadd.xlane.f32.xlu0 %v2457_v55 }
 0x179   : > { %692 = vadd.xlane.f32.xlu2 %v2467_v62  ;;  %690 = vadd.xlane.f32.xlu1 %v2471_v63 }
 0x17a   : > { %688 = vadd.xlane.f32.xlu0 %v2475_v0 }
 0x181   : > { %698 = vadd.xlane.f32.xlu2 %v2485_v7  ;;  %696 = vadd.xlane.f32.xlu1 %v2489_v8 }
 0x182   : > { %694 = vadd.xlane.f32.xlu0 %v2493_v9 }
 0x189   : > { %704 = vadd.xlane.f32.xlu2 %v2503_v16  ;;  %702 = vadd.xlane.f32.xlu1 %v2507_v17 }
 0x18a   : > { %700 = vadd.xlane.f32.xlu0 %v2511_v19 }
 0x191   : > { %710 = vadd.xlane.f32.xlu2 %v2521_v27  ;;  %708 = vadd.xlane.f32.xlu1 %v2525_v31 }
 0x192   : > { %706 = vadd.xlane.f32.xlu0 %v2529_v32 }
 0x199   : > { %716 = vadd.xlane.f32.xlu2 %v2539_v42  ;;  %714 = vadd.xlane.f32.xlu1 %v2543_v43 }
 0x19a   : > { %712 = vadd.xlane.f32.xlu0 %v2547_v47 }
 0x1a1   : > { %722 = vadd.xlane.f32.xlu2 %v2557_v57  ;;  %720 = vadd.xlane.f32.xlu1 %v2561_v58 }
 0x1a2   : > { %718 = vadd.xlane.f32.xlu0 %v2565_v59 }
 0x1a9   : > { %726 = vadd.xlane.f32.xlu1 %v2574_v3 }
 0x1aa   : > { %724 = vadd.xlane.f32.xlu0 %v2578_v4 }
 0x1cc   : > { %v673_v5 = vpop.xlane.xlu2 %672  ;;  %v669_v6 = vpop.xlane.xlu1 %668 }
 0x1cd   : > { %v730_v10 = vmul.f32 0.010416667, %v669_v6  ;;  %v665_v11 = vpop.xlane.xlu0 %664  ;;  %v732_v26 = vmul.f32 0.010416667, %v673_v5 }
 0x1ce   : > { %v728_v12 = vmul.f32 0.010416667, %v665_v11 }
 0x1cf   : > { %v2583_v13 = vsub.f32 %v2399_v29, %v730_v10  ;;  %v2610_v48 = vsub.f32 %v2395_v28, %v732_v26 }
 0x1d0   : > { %v2586_v18 = vsub.f32 %v2403_v30, %v728_v12 }
 0x1d1   : > { %v794_v14 = vmul.f32 %v2583_v13, %v2583_v13  ;;  %v796_v61 = vmul.f32 %v2610_v48, %v2610_v48 }
 0x1d2   : > { %v792_v15 = vmul.f32 %v2586_v18, %v2586_v18 }
 0x1d3   : > { %v826_v20 = vsel %vm631_vm0, %v794_v14, 0.0  ;;  %v828_v10 = vsel %vm631_vm0, %v796_v61, 0.0 }
 0x1d4   : > { %v675_v21 = vpop.xlane.xlu2 %674  ;;  %860 = vadd.xlane.f32.xlu1 %v826_v20  ;;  %v671_v22 = vpop.xlane.xlu1 %670  ;;  %v824_v24 = vsel %vm631_vm0, %v792_v15, 0.0 }
 0x1d5   : > { %v733_v29 = vmul.f32 0.010416667, %v675_v21  ;;  %v731_v25 = vmul.f32 0.010416667, %v671_v22  ;;  %856 = vadd.xlane.f32.xlu2 %v824_v24  ;;  %v667_v30 = vpop.xlane.xlu0 %666 }
 0x1d6   : > { %v729_v33 = vmul.f32 0.010416667, %v667_v30 }
 0x1d7   : > { %v2597_v34 = vsub.f32 %v2413_v35, %v733_v29  ;;  %v2600_v38 = vsub.f32 %v2417_v36, %v731_v25 }
 0x1d8   : > { %v2603_v39 = vsub.f32 %v2421_v37, %v729_v33 }
 0x1d9   : > { %v797_v40 = vmul.f32 %v2597_v34, %v2597_v34  ;;  %v795_v41 = vmul.f32 %v2600_v38, %v2600_v38 }
 0x1da   : > { %v793_v49 = vmul.f32 %v2603_v39, %v2603_v39 }
 0x1db   : > { %v829_v35 = vsel %vm631_vm0, %v797_v40, 0.0  ;;  %v827_v36 = vsel %vm631_vm0, %v795_v41, 0.0 }
 0x1dc   : > { %v681_v37 = vpop.xlane.xlu2 %680  ;;  %866 = vadd.xlane.f32.xlu1 %v829_v35  ;;  %v825_v50 = vsel %vm631_vm0, %v793_v49, 0.0  ;;  %v679_v51 = vpop.xlane.xlu1 %678 }
 0x1dd   : > { %v736_v52 = vmul.f32 0.010416667, %v681_v37  ;;  %862 = vadd.xlane.f32.xlu2 %v827_v36  ;;  %858 = vadd.xlane.f32.xlu0 %v825_v50  ;;  %v677_v28 = vpop.xlane.xlu0 %676  ;;  %v735_v60 = vmul.f32 0.010416667, %v679_v51 }
 0x1de   : > { %v734_v56 = vmul.f32 0.010416667, %v677_v28 }
 0x1df   : > { %v2623_v1 = vsub.f32 %v2431_v44, %v736_v52  ;;  %v2631_v6 = vsub.f32 %v2435_v45, %v735_v60 }
 0x1e0   : > { %v2626_v2 = vsub.f32 %v2439_v46, %v734_v56 }
 0x1e1   : > { %v800_v5 = vmul.f32 %v2623_v1, %v2623_v1  ;;  %v799_v22 = vmul.f32 %v2631_v6, %v2631_v6 }
 0x1e2   : > { %v798_v11 = vmul.f32 %v2626_v2, %v2626_v2 }
 0x1e3   : > { %v832_v12 = vsel %vm631_vm0, %v800_v5, 0.0  ;;  %v831_v26 = vsel %vm631_vm0, %v799_v22, 0.0 }
 0x1e4   : > { %v687_v44 = vpop.xlane.xlu2 %686  ;;  %872 = vadd.xlane.f32.xlu1 %v832_v12  ;;  %v830_v46 = vsel %vm631_vm0, %v798_v11, 0.0  ;;  %v685_v14 = vpop.xlane.xlu1 %684 }
 0x1e5   : > { %v739_v15 = vmul.f32 0.010416667, %v687_v44  ;;  %864 = vadd.xlane.f32.xlu0 %v828_v10  ;;  %868 = vadd.xlane.f32.xlu2 %v830_v46  ;;  %v683_v45 = vpop.xlane.xlu0 %682  ;;  %v738_v21 = vmul.f32 0.010416667, %v685_v14 }
 0x1e6   : > { %v737_v20 = vmul.f32 0.010416667, %v683_v45 }
 0x1e7   : > { %v2644_v24 = vsub.f32 %v2449_v53, %v739_v15  ;;  %v2652_v30 = vsub.f32 %v2453_v54, %v738_v21 }
 0x1e8   : > { %v2647_v29 = vsub.f32 %v2457_v55, %v737_v20 }
 0x1e9   : > { %v803_v25 = vmul.f32 %v2644_v24, %v2644_v24  ;;  %v802_v37 = vmul.f32 %v2652_v30, %v2652_v30 }
 0x1ea   : > { %v801_v33 = vmul.f32 %v2647_v29, %v2647_v29 }
 0x1eb   : > { %v835_v40 = vsel %vm631_vm0, %v803_v25, 0.0  ;;  %v834_v56 = vsel %vm631_vm0, %v802_v37, 0.0 }
 0x1ec   : > { %v693_v53 = vpop.xlane.xlu2 %692  ;;  %878 = vadd.xlane.f32.xlu1 %v835_v40  ;;  %v833_v55 = vsel %vm631_vm0, %v801_v33, 0.0  ;;  %v691_v41 = vpop.xlane.xlu1 %690 }
 0x1ed   : > { %v742_v49 = vmul.f32 0.010416667, %v693_v53  ;;  %870 = vadd.xlane.f32.xlu0 %v831_v26  ;;  %874 = vadd.xlane.f32.xlu2 %v833_v55  ;;  %v689_v54 = vpop.xlane.xlu0 %688  ;;  %v741_v36 = vmul.f32 0.010416667, %v691_v41 }
 0x1ee   : > { %v740_v35 = vmul.f32 0.010416667, %v689_v54 }
 0x1ef   : > { %v2665_v50 = vsub.f32 %v2467_v62, %v742_v49  ;;  %v2673_v28 = vsub.f32 %v2471_v63, %v741_v36 }
 0x1f0   : > { %v2668_v51 = vsub.f32 %v2475_v0, %v740_v35 }
 0x1f1   : > { %v806_v52 = vmul.f32 %v2665_v50, %v2665_v50  ;;  %v805_v44 = vmul.f32 %v2673_v28, %v2673_v28 }
 0x1f2   : > { %v804_v60 = vmul.f32 %v2668_v51, %v2668_v51 }
 0x1f3   : > { %v838_v61 = vsel %vm631_vm0, %v806_v52, 0.0  ;;  %v837_v20 = vsel %vm631_vm0, %v805_v44, 0.0 }
 0x1f4   : > { %v699_v62 = vpop.xlane.xlu2 %698  ;;  %884 = vadd.xlane.f32.xlu1 %v838_v61  ;;  %v836_v0 = vsel %vm631_vm0, %v804_v60, 0.0  ;;  %v697_v5 = vpop.xlane.xlu1 %696 }
 0x1f5   : > { %v745_v10 = vmul.f32 0.010416667, %v699_v62  ;;  %876 = vadd.xlane.f32.xlu0 %v834_v56  ;;  %880 = vadd.xlane.f32.xlu2 %v836_v0  ;;  %v695_v63 = vpop.xlane.xlu0 %694  ;;  %v744_v12 = vmul.f32 0.010416667, %v697_v5 }
 0x1f6   : > { %v743_v11 = vmul.f32 0.010416667, %v695_v63 }
 0x1f7   : > { %v2686_v46 = vsub.f32 %v2485_v7, %v745_v10  ;;  %v2694_v45 = vsub.f32 %v2489_v8, %v744_v12 }
 0x1f8   : > { %v2689_v14 = vsub.f32 %v2493_v9, %v743_v11 }
 0x1f9   : > { %v809_v15 = vmul.f32 %v2686_v46, %v2686_v46  ;;  %v808_v53 = vmul.f32 %v2694_v45, %v2694_v45 }
 0x1fa   : > { %v807_v21 = vmul.f32 %v2689_v14, %v2689_v14 }
 0x1fb   : > { %v841_v22 = vsel %vm631_vm0, %v809_v15, 0.0  ;;  %v840_v35 = vsel %vm631_vm0, %v808_v53, 0.0 }
 0x1fc   : > { %v705_v7 = vpop.xlane.xlu2 %704  ;;  %890 = vadd.xlane.f32.xlu1 %v841_v22  ;;  %v839_v9 = vsel %vm631_vm0, %v807_v21, 0.0  ;;  %v703_v25 = vpop.xlane.xlu1 %702 }
 0x1fd   : > { %v748_v26 = vmul.f32 0.010416667, %v705_v7  ;;  %882 = vadd.xlane.f32.xlu0 %v837_v20  ;;  %886 = vadd.xlane.f32.xlu2 %v839_v9  ;;  %v701_v8 = vpop.xlane.xlu0 %700  ;;  %v747_v40 = vmul.f32 0.010416667, %v703_v25 }
 0x1fe   : > { %v746_v33 = vmul.f32 0.010416667, %v701_v8 }
 0x1ff   : > { %v2707_v55 = vsub.f32 %v2503_v16, %v748_v26  ;;  %v2715_v54 = vsub.f32 %v2507_v17, %v747_v40 }
 0x200   : > { %v2710_v41 = vsub.f32 %v2511_v19, %v746_v33 }
 0x201   : > { %v812_v49 = vmul.f32 %v2707_v55, %v2707_v55  ;;  %v811_v62 = vmul.f32 %v2715_v54, %v2715_v54 }
 0x202   : > { %v810_v36 = vmul.f32 %v2710_v41, %v2710_v41 }
 0x203   : > { %v844_v37 = vsel %vm631_vm0, %v812_v49, 0.0  ;;  %v843_v11 = vsel %vm631_vm0, %v811_v62, 0.0 }
 0x204   : > { %v711_v16 = vpop.xlane.xlu2 %710  ;;  %896 = vadd.xlane.f32.xlu1 %v844_v37  ;;  %v842_v19 = vsel %vm631_vm0, %v810_v36, 0.0  ;;  %v709_v52 = vpop.xlane.xlu1 %708 }
 0x205   : > { %v751_v56 = vmul.f32 0.010416667, %v711_v16  ;;  %888 = vadd.xlane.f32.xlu0 %v840_v35  ;;  %892 = vadd.xlane.f32.xlu2 %v842_v19  ;;  %v707_v17 = vpop.xlane.xlu0 %706  ;;  %v750_v61 = vmul.f32 0.010416667, %v709_v52 }
 0x206   : > { %v749_v60 = vmul.f32 0.010416667, %v707_v17 }
 0x207   : > { %v2728_v0 = vsub.f32 %v2521_v27, %v751_v56  ;;  %v2736_v63 = vsub.f32 %v2525_v31, %v750_v61 }
 0x208   : > { %v2731_v5 = vsub.f32 %v2529_v32, %v749_v60 }
 0x209   : > { %v815_v10 = vmul.f32 %v2728_v0, %v2728_v0  ;;  %v814_v7 = vmul.f32 %v2736_v63, %v2736_v63 }
 0x20a   : > { %v813_v12 = vmul.f32 %v2731_v5, %v2731_v5 }
 0x20b   : > { %v847_v44 = vsel %vm631_vm0, %v815_v10, 0.0  ;;  %v846_v33 = vsel %vm631_vm0, %v814_v7, 0.0 }
 0x20c   : > { %v717_v27 = vpop.xlane.xlu2 %716  ;;  %902 = vadd.xlane.f32.xlu1 %v847_v44  ;;  %v845_v32 = vsel %vm631_vm0, %v813_v12, 0.0  ;;  %v715_v15 = vpop.xlane.xlu1 %714 }
 0x20d   : > { %v754_v20 = vmul.f32 0.010416667, %v717_v27  ;;  %894 = vadd.xlane.f32.xlu0 %v843_v11  ;;  %898 = vadd.xlane.f32.xlu2 %v845_v32  ;;  %v713_v31 = vpop.xlane.xlu0 %712  ;;  %v753_v22 = vmul.f32 0.010416667, %v715_v15 }
 0x20e   : > { %v752_v21 = vmul.f32 0.010416667, %v713_v31 }
 0x20f   : > { %v2749_v9 = vsub.f32 %v2539_v42, %v754_v20  ;;  %v2757_v8 = vsub.f32 %v2543_v43, %v753_v22 }
 0x210   : > { %v2752_v25 = vsub.f32 %v2547_v47, %v752_v21 }
 0x211   : > { %v818_v26 = vmul.f32 %v2749_v9, %v2749_v9  ;;  %v817_v16 = vmul.f32 %v2757_v8, %v2757_v8 }
 0x212   : > { %v816_v40 = vmul.f32 %v2752_v25, %v2752_v25 }
 0x213   : > { %v850_v53 = vsel %vm631_vm0, %v818_v26, 0.0  ;;  %v849_v60 = vsel %vm631_vm0, %v817_v16, 0.0 }
 0x214   : > { %v723_v42 = vpop.xlane.xlu2 %722  ;;  %908 = vadd.xlane.f32.xlu1 %v850_v53  ;;  %v848_v47 = vsel %vm631_vm0, %v816_v40, 0.0  ;;  %v721_v49 = vpop.xlane.xlu1 %720 }
 0x215   : > { %v757_v35 = vmul.f32 0.010416667, %v723_v42  ;;  %900 = vadd.xlane.f32.xlu0 %v846_v33  ;;  %904 = vadd.xlane.f32.xlu2 %v848_v47  ;;  %v719_v43 = vpop.xlane.xlu0 %718  ;;  %v756_v37 = vmul.f32 0.010416667, %v721_v49 }
 0x216   : > { %v755_v36 = vmul.f32 0.010416667, %v719_v43 }
 0x217   : > { %v2770_v19 = vsub.f32 %v2557_v57, %v757_v35  ;;  %v2778_v17 = vsub.f32 %v2561_v58, %v756_v37 }
 0x218   : > { %v2773_v52 = vsub.f32 %v2565_v59, %v755_v36 }
 0x219   : > { %v821_v56 = vmul.f32 %v2770_v19, %v2770_v19  ;;  %v820_v12 = vmul.f32 %v2778_v17, %v2778_v17 }
 0x21a   : > { %v819_v61 = vmul.f32 %v2773_v52, %v2773_v52 }
 0x21b   : > { %v853_v62 = vsel %vm631_vm0, %v821_v56, 0.0  ;;  %v852_v32 = vsel %vm631_vm0, %v820_v12, 0.0 }
 0x21c   : > { %914 = vadd.xlane.f32.xlu1 %v853_v62  ;;  %v851_v57 = vsel %vm631_vm0, %v819_v61, 0.0  ;;  %v727_v59 = vpop.xlane.xlu1 %726 }
 0x21d   : > { %906 = vadd.xlane.f32.xlu0 %v849_v60  ;;  %910 = vadd.xlane.f32.xlu2 %v851_v57  ;;  %v725_v10 = vpop.xlane.xlu0 %724  ;;  %v759_v58 = vmul.f32 0.010416667, %v727_v59 }
 0x21e   : > { %v758_v11 = vmul.f32 0.010416667, %v725_v10 }
 0x21f   : > { %v2794_v27 = vsub.f32 %v2574_v3, %v759_v58 }
 0x220   : > { %v2791_v44 = vsub.f32 %v2578_v4, %v758_v11 }
 0x221   : > { %v823_v31 = vmul.f32 %v2794_v27, %v2794_v27 }
 0x222   : > { %v822_v15 = vmul.f32 %v2791_v44, %v2791_v44 }
 0x223   : > { %v855_v4 = vsel %vm631_vm0, %v823_v31, 0.0 }
 0x224   : > { %v854_v20 = vsel %vm631_vm0, %v822_v15, 0.0 }
 0x225   : > { %912 = vadd.xlane.f32.xlu0 %v852_v32  ;;  %916 = vadd.xlane.f32.xlu2 %v854_v20 }
 0x22d   : > { %918 = vadd.xlane.f32.xlu0 %v855_v4 }
 0x247   : > { %v861_v3 = vpop.xlane.xlu1 %860 }
 0x248   : > { %v922_v21 = vmul.f32 0.010416667, %v861_v3  ;;  %v857_v22 = vpop.xlane.xlu2 %856 }
 0x249   : > { %v920_v7 = vmul.f32 0.010416667, %v857_v22 }
 0x24a   : > { %v954_v26 = vadd.f32 1e-05, %v922_v21 }
 0x24b   : > { %v952_v33 = vadd.f32 1e-05, %v920_v7 }
 0x24c   : > { %1796 = vrsqrt.f32 %v954_v26  ;;  %vm1010_vm1 = vweird.f32 %v954_v26 }
 0x24d   : > { %1798 = vrsqrt.f32 %v952_v33  ;;  %vm990_vm3 = vweird.f32 %v952_v33 }
 0x24f   : > { %v867_v40 = vpop.xlane.xlu1 %866 }
 0x250   : > { %v925_v53 = vmul.f32 0.010416667, %v867_v40  ;;  %v863_v42 = vpop.xlane.xlu2 %862  ;;  %v859_v47 = vpop.xlane.xlu0 %858 }
 0x251   : > { %v923_v49 = vmul.f32 0.010416667, %v863_v42  ;;  %v921_v35 = vmul.f32 0.010416667, %v859_v47 }
 0x252   : > { %v1797_v43 = vpop.eup %1796  ;;  %v2806_v36 = vadd.f32 1e-05, %v925_v53  ;;  %v2829_v53 = vld [vmem:[#allocation8 + $0x1] ss:$0 sm:$0xff] }
 0x253   : > { %v1799_v23 = vpop.eup %1798  ;;  %v1005_v37 = vmul.f32 %v1797_v43, %v954_v26  ;;  %v2808_v16 = vadd.f32 1e-05, %v923_v49  ;;  %v2810_v56 = vadd.f32 1e-05, %v921_v35  ;;  %vm1011_vm2 = vweird.f32 %v1797_v43  ;;  %v2842_v26 = vld [vmem:[#allocation8 + $0x2] ss:$0 sm:$0xff] }
 0x254   : > { %v985_v60 = vmul.f32 %v1799_v23, %v952_v33  ;;  %1800 = vrsqrt.f32 %v2806_v36  ;;  %vm991_vm4 = vweird.f32 %v1799_v23  ;;  %vm1040_vm5 = vweird.f32 %v2806_v36  ;;  %vm1012_vm7 = vmor %vm1010_vm1, %vm1011_vm2 }
 0x255   : > { %v1006_v61 = vmul.f32 %v1797_v43, %v1005_v37  ;;  %1802 = vrsqrt.f32 %v2808_v16  ;;  %vm1020_vm6 = vweird.f32 %v2808_v16  ;;  %vm992_vm8 = vmor %vm990_vm3, %vm991_vm4  ;;  %vm1000_vm9 = vweird.f32 %v2810_v56 }
 0x256   : > { %v986_v62 = vmul.f32 %v1799_v23, %v985_v60  ;;  %1804 = vrsqrt.f32 %v2810_v56 }
 0x257   : > { %v1007_v57 = vmul.f32 0.5, %v1006_v61  ;;  %v873_v59 = vpop.xlane.xlu1 %872 }
 0x258   : > { %v987_v10 = vmul.f32 0.5, %v986_v62  ;;  %v928_v11 = vmul.f32 0.010416667, %v873_v59  ;;  %v869_v58 = vpop.xlane.xlu2 %868  ;;  %v865_v12 = vpop.xlane.xlu0 %864 }
 0x259   : > { %v1008_v32 = vsub.f32 1.5, %v1007_v57  ;;  %v926_v15 = vmul.f32 0.010416667, %v869_v58  ;;  %v924_v49 = vmul.f32 0.010416667, %v865_v12 }
 0x25a   : > { %v2815_v20 = vpop.eup %1800  ;;  %v988_v31 = vsub.f32 1.5, %v987_v10  ;;  %v2818_v4 = vadd.f32 1e-05, %v928_v11 }
 0x25b   : > { %v2820_v3 = vpop.eup %1802  ;;  %v1009_v21 = vmul.f32 %v1797_v43, %v1008_v32  ;;  %v1035_v22 = vmul.f32 %v2815_v20, %v2806_v36  ;;  %v2825_v7 = vadd.f32 1e-05, %v926_v15  ;;  %vm1041_vm10 = vweird.f32 %v2815_v20 }
 0x25c   : > { %v2827_v40 = vpop.eup %1804  ;;  %v989_v42 = vmul.f32 %v1799_v23, %v988_v31  ;;  %v1015_v47 = vmul.f32 %v2820_v3, %v2808_v16  ;;  %1806 = vrsqrt.f32 %v2818_v4  ;;  %vm1021_vm11 = vweird.f32 %v2820_v3  ;;  %vm2862_vm12 = vmor %vm1040_vm5, %vm1041_vm10 }
 0x25d   : > { %v1013_v35 = vsel %vm1012_vm7, %v1797_v43, %v1009_v21  ;;  %v1036_v37 = vmul.f32 %v2815_v20, %v1035_v22  ;;  %v995_v60 = vmul.f32 %v2827_v40, %v2810_v56  ;;  %1808 = vrsqrt.f32 %v2825_v7  ;;  %vm1022_vm0 = vmor %vm1020_vm6, %vm1021_vm11 }
 0x25e   : > { %v1306_v61 = vmul.f32 %v1013_v35, %v2583_v13  ;;  %v993_v62 = vsel %vm992_vm8, %v1799_v23, %v989_v42  ;;  %v1016_v57 = vmul.f32 %v2820_v3, %v1015_v47  ;;  %v2852_v12 = vadd.f32 1e-05, %v924_v49 }
 0x25f   : > { %v1304_v43 = vmul.f32 %v993_v62, %v2586_v18  ;;  %v1037_v33 = vmul.f32 0.5, %v1036_v37  ;;  %v996_v59 = vmul.f32 %v2827_v40, %v995_v60  ;;  %v879_v10 = vpop.xlane.xlu1 %878  ;;  %vm1001_vm13 = vweird.f32 %v2827_v40 }
 0x260   : > { %v1340_v11 = vmul.f32 %v2829_v53, %v1306_v61  ;;  %v1017_v58 = vmul.f32 0.5, %v1016_v57  ;;  %v931_v15 = vmul.f32 0.010416667, %v879_v10  ;;  %1810 = vrsqrt.f32 %v2852_v12  ;;  %v875_v42 = vpop.xlane.xlu2 %874  ;;  %v871_v47 = vpop.xlane.xlu0 %870  ;;  %vm1002_vm1 = vmor %vm1000_vm9, %vm1001_vm13 }
 0x261   : > { %v1338_v13 = vmul.f32 %v2829_v53, %v1304_v43  ;;  %v1038_v23 = vsub.f32 1.5, %v1037_v33  ;;  %v997_v32 = vmul.f32 0.5, %v996_v59  ;;  %vm1070_vm14 = vweird.f32 %v2818_v4 }
 0x262   : > { %v2855_v18 = vpop.eup %1806  ;;  %v1374_v31 = vadd.f32 %v2842_v26, %v1340_v11  ;;  %v1018_v22 = vsub.f32 1.5, %v1017_v58  ;;  %v2876_v61 = vadd.f32 1e-05, %v931_v15  ;;  %v929_v59 = vmul.f32 0.010416667, %v875_v42 }
 0x263   : > { %v1372_v49 = vadd.f32 %v2842_v26, %v1338_v13  ;;  %v1039_v35 = vmul.f32 %v2815_v20, %v1038_v23  ;;  %v998_v37 = vsub.f32 1.5, %v997_v32  ;;  %v1065_v36 = vmul.f32 %v2855_v18, %v2818_v4  ;;  %v1809_v62 = vpop.eup %1808 }
 0x264   : > { %1406 = vst [vmem:[%s2333_s3 + $0x10] sm:$0xff] %v1374_v31  ;;  %v1019_v60 = vmul.f32 %v2820_v3, %v1018_v22  ;;  %vm1071_vm15 = vweird.f32 %v2855_v18  ;;  %v927_v58 = vmul.f32 0.010416667, %v871_v47  ;;  %1812 = vrsqrt.f32 %v2876_v61 }
 0x265   : > { %1404 = vst [vmem:[%s2333_s3] sm:$0xff] %v1372_v49  ;;  %v1043_v57 = vsel %vm2862_vm12, %v2815_v20, %v1039_v35  ;;  %v999_v43 = vmul.f32 %v2827_v40, %v998_v37  ;;  %v1066_v33 = vmul.f32 %v2855_v18, %v1065_v36  ;;  %v1045_v20 = vmul.f32 %v1809_v62, %v2825_v7  ;;  %vm2909_vm3 = vmor %vm1070_vm14, %vm1071_vm15 }
 0x266   : > { %v1309_v10 = vmul.f32 %v1043_v57, %v2597_v34  ;;  %v1023_v11 = vsel %vm1022_vm0, %v2820_v3, %v1019_v60  ;;  %v1811_v15 = vpop.eup %1810  ;;  %vm1050_vm2 = vweird.f32 %v2825_v7  ;;  %v2913_v47 = vadd.f32 1e-05, %v929_v59 }
 0x267   : > { %v1307_v16 = vmul.f32 %v1023_v11, %v2600_v38  ;;  %v1003_v13 = vsel %vm1002_vm1, %v2827_v40, %v999_v43  ;;  %v1067_v23 = vmul.f32 0.5, %v1066_v33  ;;  %v885_v32 = vpop.xlane.xlu1 %884  ;;  %v1046_v31 = vmul.f32 %v1809_v62, %v1045_v20 }
 0x268   : > { %v1343_v34 = vmul.f32 %v2829_v53, %v1309_v10  ;;  %v1305_v3 = vmul.f32 %v1003_v13, %v2603_v39  ;;  %v1025_v38 = vmul.f32 %v1811_v15, %v2852_v12  ;;  %v2917_v36 = vadd.f32 1e-05, %v927_v58  ;;  %v881_v57 = vpop.xlane.xlu2 %880  ;;  %v877_v43 = vpop.xlane.xlu0 %876 }
 0x269   : > { %v1341_v56 = vmul.f32 %v2829_v53, %v1307_v16  ;;  %v1068_v21 = vsub.f32 1.5, %v1067_v23  ;;  %v1047_v39 = vmul.f32 0.5, %v1046_v31  ;;  %vm1051_vm4 = vweird.f32 %v1809_v62 }
 0x26a   : > { %v1377_v40 = vadd.f32 %v2842_v26, %v1343_v34  ;;  %v1339_v22 = vmul.f32 %v2829_v53, %v1305_v3  ;;  %v1026_v37 = vmul.f32 %v1811_v15, %v1025_v38  ;;  %1814 = vrsqrt.f32 %v2913_v47  ;;  %v1813_v33 = vpop.eup %1812  ;;  %vm1052_vm6 = vmor %vm1050_vm2, %vm1051_vm4 }
 0x26b   : > { %v1375_v49 = vadd.f32 %v2842_v26, %v1341_v56  ;;  %v1069_v35 = vmul.f32 %v2855_v18, %v1068_v21  ;;  %v1048_v4 = vsub.f32 1.5, %v1047_v39  ;;  %1816 = vrsqrt.f32 %v2917_v36 }
 0x26c   : > { %1409 = vst [vmem:[%s2333_s3 + $0x28] sm:$0xff] %v1377_v40  ;;  %v1373_v60 = vadd.f32 %v2842_v26, %v1339_v22  ;;  %v1027_v10 = vmul.f32 0.5, %v1026_v37  ;;  %vm1030_vm5 = vweird.f32 %v2852_v12  ;;  %v1095_v58 = vmul.f32 %v1813_v33, %v2876_v61 }
 0x26d   : > { %1407 = vst [vmem:[%s2333_s3 + $0x18] sm:$0xff] %v1375_v49  ;;  %v1073_v59 = vsel %vm2909_vm3, %v2855_v18, %v1069_v35  ;;  %v1049_v20 = vmul.f32 %v1809_v62, %v1048_v4  ;;  %vm1031_vm7 = vweird.f32 %v1811_v15  ;;  %v934_v13 = vmul.f32 0.010416667, %v885_v32 }
 0x26e   : > { %1405 = vst [vmem:[%s2333_s3 + $0x8] sm:$0xff] %v1373_v60  ;;  %v1312_v11 = vmul.f32 %v1073_v59, %v2623_v1  ;;  %v1028_v16 = vsub.f32 1.5, %v1027_v10  ;;  %v932_v23 = vmul.f32 0.010416667, %v881_v57  ;;  %v1096_v31 = vmul.f32 %v1813_v33, %v1095_v58  ;;  %vm1032_vm9 = vmor %vm1030_vm5, %vm1031_vm7 }
 0x26f   : > { %v891_v34 = vpop.xlane.xlu1 %890  ;;  %v1053_v3 = vsel %vm1052_vm6, %v1809_v62, %v1049_v20  ;;  %v930_v56 = vmul.f32 0.010416667, %v877_v43  ;;  %vm1100_vm8 = vweird.f32 %v2876_v61  ;;  %v2936_v38 = vadd.f32 1e-05, %v934_v13 }
 0x270   : > { %v1346_v18 = vmul.f32 %v2829_v53, %v1312_v11  ;;  %v1310_v1 = vmul.f32 %v1053_v3, %v2626_v2  ;;  %v1029_v21 = vmul.f32 %v1811_v15, %v1028_v16  ;;  %v2938_v7 = vpop.eup %1814  ;;  %v1097_v32 = vmul.f32 0.5, %v1096_v31  ;;  %v887_v10 = vpop.xlane.xlu2 %886 }
 0x271   : > { %vm1101_vm10 = vweird.f32 %v1813_v33  ;;  %v2943_v62 = vadd.f32 1e-05, %v932_v23  ;;  %v2945_v22 = vpop.eup %1816  ;;  %v1075_v39 = vmul.f32 %v2938_v7, %v2913_v47  ;;  %v2950_v49 = vadd.f32 1e-05, %v930_v56  ;;  %v883_v11 = vpop.xlane.xlu0 %882 }
 0x272   : > { %v1380_v40 = vadd.f32 %v2842_v26, %v1346_v18  ;;  %v1344_v2 = vmul.f32 %v2829_v53, %v1310_v1  ;;  %v1033_v42 = vsel %vm1032_vm9, %v1811_v15, %v1029_v21  ;;  %v1098_v12 = vsub.f32 1.5, %v1097_v32  ;;  %vm2959_vm11 = vmor %vm1100_vm8, %vm1101_vm10 }
 0x273   : > { %v1308_v35 = vmul.f32 %v1033_v42, %v2610_v48  ;;  %v1055_v37 = vmul.f32 %v2945_v22, %v2917_v36  ;;  %v937_v60 = vmul.f32 0.010416667, %v891_v34  ;;  %v1076_v57 = vmul.f32 %v2938_v7, %v1075_v39 }
 0x274   : > { %1412 = vst [vmem:[%s2333_s3 + $0x40] sm:$0xff] %v1380_v40  ;;  %v1378_v4 = vadd.f32 %v2842_v26, %v1344_v2  ;;  %1818 = vrsqrt.f32 %v2936_v38  ;;  %v1099_v48 = vmul.f32 %v1813_v33, %v1098_v12  ;;  %vm1080_vm12 = vweird.f32 %v2913_v47 }
 0x275   : > { %v1342_v43 = vmul.f32 %v2829_v53, %v1308_v35  ;;  %v1056_v59 = vmul.f32 %v2945_v22, %v1055_v37  ;;  %1820 = vrsqrt.f32 %v2943_v62  ;;  %v1077_v61 = vmul.f32 0.5, %v1076_v57 }
 0x276   : > { %1410 = vst [vmem:[%s2333_s3 + $0x30] sm:$0xff] %v1378_v4  ;;  %vm1081_vm13 = vweird.f32 %v2938_v7  ;;  %1822 = vrsqrt.f32 %v2950_v49  ;;  %v1103_v58 = vsel %vm2959_vm11, %v1813_v33, %v1099_v48  ;;  %v2975_v13 = vadd.f32 1e-05, %v937_v60 }
 0x277   : > { %v1376_v20 = vadd.f32 %v2842_v26, %v1342_v43  ;;  %v1057_v16 = vmul.f32 0.5, %v1056_v59  ;;  %v1315_v23 = vmul.f32 %v1103_v58, %v2644_v24  ;;  %v1078_v34 = vsub.f32 1.5, %v1077_v61  ;;  %v897_v31 = vpop.xlane.xlu1 %896  ;;  %vm1082_vm1 = vmor %vm1080_vm12, %vm1081_vm13 }
 0x278   : > { %v935_v18 = vmul.f32 0.010416667, %v887_v10  ;;  %v933_v3 = vmul.f32 0.010416667, %v883_v11  ;;  %vm1060_vm14 = vweird.f32 %v2917_v36  ;;  %vm1061_vm15 = vweird.f32 %v2945_v22  ;;  %v893_v10 = vpop.xlane.xlu2 %892 }
 0x279   : > { %1408 = vst [vmem:[%s2333_s3 + $0x20] sm:$0xff] %v1376_v20  ;;  %v1058_v56 = vsub.f32 1.5, %v1057_v16  ;;  %1824 = vrsqrt.f32 %v2975_v13  ;;  %v1349_v33 = vmul.f32 %v2829_v53, %v1315_v23  ;;  %v1079_v21 = vmul.f32 %v2938_v7, %v1078_v34  ;;  %vm1062_vm3 = vmor %vm1060_vm14, %vm1061_vm15  ;;  %v889_v11 = vpop.xlane.xlu0 %888 }
 0x27a   : > { %v2982_v1 = vpop.eup %1818  ;;  %vm1130_vm0 = vweird.f32 %v2936_v38  ;;  %v2987_v24 = vadd.f32 1e-05, %v935_v18  ;;  %vm1110_vm2 = vweird.f32 %v2943_v62  ;;  %v940_v42 = vmul.f32 0.010416667, %v897_v31 }
 0x27b   : > { %v2989_v40 = vpop.eup %1820  ;;  %v1059_v32 = vmul.f32 %v2945_v22, %v1058_v56  ;;  %v1125_v2 = vmul.f32 %v2982_v1, %v2936_v38  ;;  %v1383_v35 = vadd.f32 %v2842_v26, %v1349_v33  ;;  %v1083_v12 = vsel %vm1082_vm1, %v2938_v7, %v1079_v21 }
 0x27c   : > { %v2999_v39 = vpop.eup %1822  ;;  %v1105_v47 = vmul.f32 %v2989_v40, %v2943_v62  ;;  %vm1160_vm4 = vweird.f32 %v2975_v13  ;;  %v3010_v37 = vadd.f32 1e-05, %v933_v3  ;;  %v1313_v60 = vmul.f32 %v1083_v12, %v2647_v29 }
 0x27d   : > { %v1063_v4 = vsel %vm1062_vm3, %v2945_v22, %v1059_v32  ;;  %v1126_v15 = vmul.f32 %v2982_v1, %v1125_v2  ;;  %v1085_v7 = vmul.f32 %v2999_v39, %v2950_v49  ;;  %vm1090_vm5 = vweird.f32 %v2950_v49  ;;  %1415 = vst [vmem:[%s2333_s3 + $0x58] sm:$0xff] %v1383_v35 }
 0x27e   : > { %v1311_v36 = vmul.f32 %v1063_v4, %v2631_v6  ;;  %vm1131_vm6 = vweird.f32 %v2982_v1  ;;  %v1106_v57 = vmul.f32 %v2989_v40, %v1105_v47  ;;  %1826 = vrsqrt.f32 %v2987_v24 }
 0x27f   : > { %v3023_v43 = vpop.eup %1824  ;;  %v1347_v29 = vmul.f32 %v2829_v53, %v1313_v60  ;;  %v1127_v22 = vmul.f32 0.5, %v1126_v15  ;;  %v1086_v48 = vmul.f32 %v2999_v39, %v1085_v7  ;;  %v3027_v59 = vadd.f32 1e-05, %v940_v42  ;;  %vm3040_vm8 = vmor %vm1130_vm0, %vm1131_vm6 }
 0x280   : > { %v1345_v6 = vmul.f32 %v2829_v53, %v1311_v36  ;;  %v1107_v61 = vmul.f32 0.5, %v1106_v57  ;;  %vm1111_vm7 = vweird.f32 %v2989_v40  ;;  %v1155_v20 = vmul.f32 %v3023_v43, %v2975_v13 }
 0x281   : > { %v1381_v58 = vadd.f32 %v2842_v26, %v1347_v29  ;;  %v1128_v16 = vsub.f32 1.5, %v1127_v22  ;;  %v1087_v23 = vmul.f32 0.5, %v1086_v48  ;;  %1828 = vrsqrt.f32 %v3010_v37  ;;  %vm1112_vm12 = vmor %vm1110_vm2, %vm1111_vm7  ;;  %v903_v29 = vpop.xlane.xlu1 %902 }
 0x282   : > { %v1379_v34 = vadd.f32 %v2842_v26, %v1345_v6  ;;  %v1108_v3 = vsub.f32 1.5, %v1107_v61  ;;  %vm1091_vm9 = vweird.f32 %v2999_v39  ;;  %v1156_v31 = vmul.f32 %v3023_v43, %v1155_v20  ;;  %v895_v6 = vpop.xlane.xlu0 %894 }
 0x283   : > { %1413 = vst [vmem:[%s2333_s3 + $0x48] sm:$0xff] %v1381_v58  ;;  %v1129_v56 = vmul.f32 %v2982_v1, %v1128_v16  ;;  %v1088_v33 = vsub.f32 1.5, %v1087_v23  ;;  %vm1140_vm10 = vweird.f32 %v2987_v24  ;;  %1830 = vrsqrt.f32 %v3027_v59  ;;  %vm1092_vm13 = vmor %vm1090_vm5, %vm1091_vm9 }
 0x284   : > { %v3050_v21 = vpop.eup %1826  ;;  %1411 = vst [vmem:[%s2333_s3 + $0x38] sm:$0xff] %v1379_v34  ;;  %v1109_v38 = vmul.f32 %v2989_v40, %v1108_v3  ;;  %v1157_v32 = vmul.f32 0.5, %v1156_v31  ;;  %vm1161_vm11 = vweird.f32 %v3023_v43  ;;  %v938_v2 = vmul.f32 0.010416667, %v893_v10 }
 0x285   : > { %v1133_v42 = vsel %vm3040_vm8, %v2982_v1, %v1129_v56  ;;  %v1089_v35 = vmul.f32 %v2999_v39, %v1088_v33  ;;  %v1135_v12 = vmul.f32 %v3050_v21, %v2987_v24  ;;  %v936_v47 = vmul.f32 0.010416667, %v889_v11  ;;  %vm3081_vm14 = vmor %vm1160_vm4, %vm1161_vm11  ;;  %v899_v11 = vpop.xlane.xlu2 %898 }
 0x286   : > { %v1318_v60 = vmul.f32 %v1133_v42, %v2665_v50  ;;  %v1113_v4 = vsel %vm1112_vm12, %v2989_v40, %v1109_v38  ;;  %v1158_v1 = vsub.f32 1.5, %v1157_v32  ;;  %v3071_v15 = vadd.f32 1e-05, %v938_v2 }
 0x287   : > { %v3073_v62 = vpop.eup %1828  ;;  %v1316_v7 = vmul.f32 %v1113_v4, %v2668_v51  ;;  %v1093_v36 = vsel %vm1092_vm13, %v2999_v39, %v1089_v35  ;;  %v1136_v49 = vmul.f32 %v3050_v21, %v1135_v12  ;;  %vm1141_vm15 = vweird.f32 %v3050_v21 }
 0x288   : > { %v1352_v40 = vmul.f32 %v2829_v53, %v1318_v60  ;;  %v1314_v57 = vmul.f32 %v1093_v36, %v2652_v30  ;;  %v1159_v51 = vmul.f32 %v3023_v43, %v1158_v1  ;;  %v1115_v39 = vmul.f32 %v3073_v62, %v3010_v37  ;;  %vm1142_vm2 = vmor %vm1140_vm10, %vm1141_vm15 }
 0x289   : > { %v3092_v13 = vpop.eup %1830  ;;  %v1350_v22 = vmul.f32 %v2829_v53, %v1316_v7  ;;  %v1137_v48 = vmul.f32 0.5, %v1136_v49  ;;  %1832 = vrsqrt.f32 %v3071_v15  ;;  %v3096_v10 = vadd.f32 1e-05, %v936_v47 }
 0x28a   : > { %v1386_v30 = vadd.f32 %v2842_v26, %v1352_v40  ;;  %v1348_v61 = vmul.f32 %v2829_v53, %v1314_v57  ;;  %v1163_v20 = vsel %vm3081_vm14, %v3023_v43, %v1159_v51  ;;  %v1116_v58 = vmul.f32 %v3073_v62, %v1115_v39  ;;  %v909_v40 = vpop.xlane.xlu1 %908 }
 0x28b   : > { %v1384_v16 = vadd.f32 %v2842_v26, %v1350_v22  ;;  %v1321_v23 = vmul.f32 %v1163_v20, %v2686_v46  ;;  %v1138_v34 = vsub.f32 1.5, %v1137_v48  ;;  %v1185_v18 = vmul.f32 %v3092_v13, %v3027_v59 }
 0x28c   : > { %1418 = vst [vmem:[%s2333_s3 + $0x70] sm:$0xff] %v1386_v30  ;;  %v1382_v3 = vadd.f32 %v2842_v26, %v1348_v61  ;;  %v1117_v31 = vmul.f32 0.5, %v1116_v58  ;;  %vm1121_vm0 = vweird.f32 %v3073_v62  ;;  %vm1190_vm1 = vweird.f32 %v3027_v59 }
 0x28d   : > { %1416 = vst [vmem:[%s2333_s3 + $0x60] sm:$0xff] %v1384_v16  ;;  %v1355_v43 = vmul.f32 %v2829_v53, %v1321_v23  ;;  %v1139_v56 = vmul.f32 %v3050_v21, %v1138_v34  ;;  %v1186_v33 = vmul.f32 %v3092_v13, %v1185_v18  ;;  %1834 = vrsqrt.f32 %v3096_v10 }
 0x28e   : > { %1414 = vst [vmem:[%s2333_s3 + $0x50] sm:$0xff] %v1382_v3  ;;  %v1118_v46 = vsub.f32 1.5, %v1117_v31  ;;  %vm1191_vm3 = vweird.f32 %v3092_v13  ;;  %v943_v38 = vmul.f32 0.010416667, %v903_v29  ;;  %v941_v32 = vmul.f32 0.010416667, %v899_v11  ;;  %v901_v29 = vpop.xlane.xlu0 %900 }
 0x28f   : > { %v1833_v2 = vpop.eup %1832  ;;  %v1389_v42 = vadd.f32 %v2842_v26, %v1355_v43  ;;  %v1143_v35 = vsel %vm1142_vm2, %v3050_v21, %v1139_v56  ;;  %v1187_v12 = vmul.f32 0.5, %v1186_v33  ;;  %v939_v47 = vmul.f32 0.010416667, %v895_v6  ;;  %vm3142_vm6 = vmor %vm1190_vm1, %vm1191_vm3 }
 0x290   : > { %v1319_v60 = vmul.f32 %v1143_v35, %v2689_v14  ;;  %v1119_v4 = vmul.f32 %v3073_v62, %v1118_v46  ;;  %vm1120_vm4 = vweird.f32 %v3010_v37  ;;  %v1165_v24 = vmul.f32 %v1833_v2, %v3071_v15 }
 0x291   : > { %1421 = vst [vmem:[%s2333_s3 + $0x88] sm:$0xff] %v1389_v42  ;;  %vm1122_vm5 = vmor %vm1120_vm4, %vm1121_vm0  ;;  %v1188_v1 = vsub.f32 1.5, %v1187_v12  ;;  %v3132_v7 = vadd.f32 1e-05, %v943_v38  ;;  %v3134_v36 = vadd.f32 1e-05, %v941_v32  ;;  %vm1170_vm7 = vweird.f32 %v3071_v15 }
 0x292   : > { %v1353_v21 = vmul.f32 %v2829_v53, %v1319_v60  ;;  %v1123_v50 = vsel %vm1122_vm5, %v3073_v62, %v1119_v4  ;;  %v1166_v37 = vmul.f32 %v1833_v2, %v1165_v24  ;;  %v3146_v49 = vadd.f32 1e-05, %v939_v47  ;;  %v905_v62 = vpop.xlane.xlu2 %904  ;;  %v915_v12 = vpop.xlane.xlu1 %914 }
 0x293   : > { %v1835_v57 = vpop.eup %1834  ;;  %v1317_v51 = vmul.f32 %v1123_v50, %v2673_v28  ;;  %v1189_v39 = vmul.f32 %v3092_v13, %v1188_v1  ;;  %1836 = vrsqrt.f32 %v3132_v7  ;;  %vm1171_vm8 = vweird.f32 %v1833_v2 }
 0x294   : > { %v1387_v59 = vadd.f32 %v2842_v26, %v1353_v21  ;;  %v1167_v22 = vmul.f32 0.5, %v1166_v37  ;;  %v1145_v48 = vmul.f32 %v1835_v57, %v3096_v10  ;;  %1838 = vrsqrt.f32 %v3134_v36  ;;  %vm1172_vm9 = vmor %vm1170_vm7, %vm1171_vm8 }
 0x295   : > { %v1351_v11 = vmul.f32 %v2829_v53, %v1317_v51  ;;  %v1193_v28 = vsel %vm3142_vm6, %v3092_v13, %v1189_v39  ;;  %1840 = vrsqrt.f32 %v3146_v49  ;;  %v946_v58 = vmul.f32 0.010416667, %v909_v40 }
 0x296   : > { %1419 = vst [vmem:[%s2333_s3 + $0x78] sm:$0xff] %v1387_v59  ;;  %v1324_v6 = vmul.f32 %v1193_v28, %v2707_v55  ;;  %v1168_v30 = vsub.f32 1.5, %v1167_v22  ;;  %v1146_v61 = vmul.f32 %v1835_v57, %v1145_v48  ;;  %v944_v16 = vmul.f32 0.010416667, %v905_v62  ;;  %v3198_v4 = vpop.xlane.xlu0 %906 }
 0x297   : > { %v1385_v20 = vadd.f32 %v2842_v26, %v1351_v11  ;;  %vm1150_vm10 = vweird.f32 %v3096_v10  ;;  %vm1151_vm11 = vweird.f32 %v1835_v57  ;;  %v3171_v55 = vadd.f32 1e-05, %v946_v58 }
 0x298   : > { %v1358_v23 = vmul.f32 %v2829_v53, %v1324_v6  ;;  %v1169_v34 = vmul.f32 %v1833_v2, %v1168_v30  ;;  %v1147_v18 = vmul.f32 0.5, %v1146_v61  ;;  %v3173_v13 = vadd.f32 1e-05, %v944_v16  ;;  %vm1152_vm14 = vmor %vm1150_vm10, %vm1151_vm11 }
 0x299   : > { %v3164_v3 = vpop.eup %1836  ;;  %1417 = vst [vmem:[%s2333_s3 + $0x68] sm:$0xff] %v1385_v20  ;;  %vm1220_vm12 = vweird.f32 %v3132_v7  ;;  %1842 = vrsqrt.f32 %v3171_v55  ;;  %v942_v38 = vmul.f32 0.010416667, %v901_v29  ;;  %vm1200_vm13 = vweird.f32 %v3134_v36 }
 0x29a   : > { %v1392_v31 = vadd.f32 %v2842_v26, %v1358_v23  ;;  %v1173_v43 = vsel %vm1172_vm9, %v1833_v2, %v1169_v34  ;;  %v1148_v56 = vsub.f32 1.5, %v1147_v18  ;;  %v1215_v33 = vmul.f32 %v3164_v3, %v3132_v7  ;;  %v3178_v46 = vpop.eup %1838  ;;  %v911_v60 = vpop.xlane.xlu2 %910 }
 0x29b   : > { %v1322_v15 = vmul.f32 %v1173_v43, %v2710_v41  ;;  %v3183_v32 = vpop.eup %1840  ;;  %v1195_v2 = vmul.f32 %v3178_v46, %v3134_v36  ;;  %vm1180_vm15 = vweird.f32 %v3146_v49  ;;  %1844 = vrsqrt.f32 %v3173_v13 }
 0x29c   : > { %1424 = vst [vmem:[%s2333_s3 + $0xa0] sm:$0xff] %v1392_v31  ;;  %v1149_v42 = vmul.f32 %v1835_v57, %v1148_v56  ;;  %v1216_v35 = vmul.f32 %v3164_v3, %v1215_v33  ;;  %v1175_v41 = vmul.f32 %v3183_v32, %v3146_v49  ;;  %vm1221_vm0 = vweird.f32 %v3164_v3 }
 0x29d   : > { %v1356_v47 = vmul.f32 %v2829_v53, %v1322_v15  ;;  %v1196_v21 = vmul.f32 %v3178_v46, %v1195_v2  ;;  %v3205_v37 = vadd.f32 1e-05, %v942_v38  ;;  %v949_v39 = vmul.f32 0.010416667, %v915_v12  ;;  %vm3213_vm1 = vmor %vm1220_vm12, %vm1221_vm0 }
 0x29e   : > { %v1153_v24 = vsel %vm1152_vm14, %v1835_v57, %v1149_v42  ;;  %v1217_v1 = vmul.f32 0.5, %v1216_v35  ;;  %v1176_v14 = vmul.f32 %v3183_v32, %v1175_v41  ;;  %v947_v62 = vmul.f32 0.010416667, %v911_v60 }
 0x29f   : > { %v1390_v10 = vadd.f32 %v2842_v26, %v1356_v47  ;;  %v1320_v50 = vmul.f32 %v1153_v24, %v2694_v45  ;;  %v1197_v51 = vmul.f32 0.5, %v1196_v21  ;;  %v3207_v29 = vpop.eup %1842  ;;  %vm1201_vm2 = vweird.f32 %v3178_v46 }
 0x2a0   : > { %v1218_v40 = vsub.f32 1.5, %v1217_v1  ;;  %v1177_v45 = vmul.f32 0.5, %v1176_v14  ;;  %1846 = vrsqrt.f32 %v3205_v37  ;;  %vm1181_vm3 = vweird.f32 %v3183_v32  ;;  %vm1202_vm4 = vmor %vm1200_vm13, %vm1201_vm2 }
 0x2a1   : > { %1422 = vst [vmem:[%s2333_s3 + $0x90] sm:$0xff] %v1390_v10  ;;  %v1354_v57 = vmul.f32 %v2829_v53, %v1320_v50  ;;  %v1198_v48 = vsub.f32 1.5, %v1197_v51  ;;  %v1245_v11 = vmul.f32 %v3207_v29, %v3171_v55  ;;  %v3223_v28 = vpop.eup %1844  ;;  %v3226_v30 = vadd.f32 1e-05, %v949_v39  ;;  %vm1182_vm6 = vmor %vm1180_vm15, %vm1181_vm3 }
 0x2a2   : > { %v1219_v22 = vmul.f32 %v3164_v3, %v1218_v40  ;;  %v1178_v6 = vsub.f32 1.5, %v1177_v45  ;;  %v3228_v61 = vadd.f32 1e-05, %v947_v62  ;;  %v1225_v23 = vmul.f32 %v3223_v28, %v3173_v13  ;;  %v917_v35 = vpop.xlane.xlu2 %916 }
 0x2a3   : > { %v1388_v7 = vadd.f32 %v2842_v26, %v1354_v57  ;;  %v1199_v58 = vmul.f32 %v3178_v46, %v1198_v48  ;;  %v1246_v16 = vmul.f32 %v3207_v29, %v1245_v11  ;;  %vm1250_vm5 = vweird.f32 %v3171_v55 }
 0x2a4   : > { %v1223_v20 = vsel %vm3213_vm1, %v3164_v3, %v1219_v22  ;;  %v1179_v18 = vmul.f32 %v3183_v32, %v1178_v6  ;;  %1848 = vrsqrt.f32 %v3226_v30  ;;  %vm1251_vm7 = vweird.f32 %v3207_v29 }
 0x2a5   : > { %1420 = vst [vmem:[%s2333_s3 + $0x80] sm:$0xff] %v1388_v7  ;;  %v1327_v34 = vmul.f32 %v1223_v20, %v2728_v0  ;;  %v1203_v3 = vsel %vm1202_vm4, %v3178_v46, %v1199_v58  ;;  %v1247_v31 = vmul.f32 0.5, %v1246_v16  ;;  %v1226_v0 = vmul.f32 %v3223_v28, %v1225_v23  ;;  %v913_v46 = vpop.xlane.xlu0 %912  ;;  %vm3265_vm8 = vmor %vm1250_vm5, %vm1251_vm7 }
 0x2a6   : > { %v1847_v36 = vpop.eup %1846  ;;  %v1325_v56 = vmul.f32 %v1203_v3, %v2731_v5  ;;  %v1183_v33 = vsel %vm1182_vm6, %v3183_v32, %v1179_v18  ;;  %1850 = vrsqrt.f32 %v3228_v61  ;;  %vm1230_vm9 = vweird.f32 %v3173_v13 }
 0x2a7   : > { %v1361_v43 = vmul.f32 %v2829_v53, %v1327_v34  ;;  %v1323_v15 = vmul.f32 %v1183_v33, %v2715_v54  ;;  %v1248_v49 = vsub.f32 1.5, %v1247_v31  ;;  %v1227_v38 = vmul.f32 0.5, %v1226_v0 }
 0x2a8   : > { %v1205_v42 = vmul.f32 %v1847_v36, %v3205_v37  ;;  %v1359_v12 = vmul.f32 %v2829_v53, %v1325_v56  ;;  %vm1231_vm10 = vweird.f32 %v3223_v28  ;;  %vm1210_vm11 = vweird.f32 %v3205_v37 }
 0x2a9   : > { %v1395_v2 = vadd.f32 %v2842_v26, %v1361_v43  ;;  %v1357_v54 = vmul.f32 %v2829_v53, %v1323_v15  ;;  %v1249_v32 = vmul.f32 %v3207_v29, %v1248_v49  ;;  %v1228_v47 = vsub.f32 1.5, %v1227_v38  ;;  %vm1232_vm12 = vmor %vm1230_vm9, %vm1231_vm10 }
 0x2aa   : > { %v1206_v41 = vmul.f32 %v1847_v36, %v1205_v42  ;;  %v1849_v60 = vpop.eup %1848  ;;  %v1393_v55 = vadd.f32 %v2842_v26, %v1359_v12  ;;  %v945_v24 = vmul.f32 0.010416667, %v3198_v4  ;;  %v950_v1 = vmul.f32 0.010416667, %v917_v35 }
 0x2ab   : > { %1427 = vst [vmem:[%s2333_s3 + $0xb8] sm:$0xff] %v1395_v2  ;;  %v1391_v21 = vadd.f32 %v2842_v26, %v1357_v54  ;;  %v1253_v10 = vsel %vm3265_vm8, %v3207_v29, %v1249_v32  ;;  %v1229_v50 = vmul.f32 %v3223_v28, %v1228_v47  ;;  %v1275_v4 = vmul.f32 %v1849_v60, %v3226_v30 }
 0x2ac   : > { %v1207_v14 = vmul.f32 0.5, %v1206_v41  ;;  %v1851_v40 = vpop.eup %1850  ;;  %1425 = vst [vmem:[%s2333_s3 + $0xa8] sm:$0xff] %v1393_v55  ;;  %v1330_v51 = vmul.f32 %v1253_v10, %v2749_v9  ;;  %vm1280_vm13 = vweird.f32 %v3226_v30  ;;  %v3290_v39 = vadd.f32 1e-05, %v945_v24 }
 0x2ad   : > { %1423 = vst [vmem:[%s2333_s3 + $0x98] sm:$0xff] %v1391_v21  ;;  %v1233_v62 = vsel %vm1232_vm12, %v3223_v28, %v1229_v50  ;;  %vm1211_vm14 = vweird.f32 %v1847_v36  ;;  %v1255_v57 = vmul.f32 %v1851_v40, %v3228_v61  ;;  %v1276_v13 = vmul.f32 %v1849_v60, %v1275_v4 }
 0x2ae   : > { %v1208_v29 = vsub.f32 1.5, %v1207_v14  ;;  %v1364_v9 = vmul.f32 %v2829_v53, %v1330_v51  ;;  %v1328_v59 = vmul.f32 %v1233_v62, %v2752_v25  ;;  %1852 = vrsqrt.f32 %v3290_v39  ;;  %vm1212_vm0 = vmor %vm1210_vm11, %vm1211_vm14  ;;  %v919_v25 = vpop.xlane.xlu0 %918 }
 0x2af   : > { %vm1281_vm15 = vweird.f32 %v1849_v60  ;;  %v1256_v22 = vmul.f32 %v1851_v40, %v1255_v57  ;;  %v3298_v48 = vadd.f32 1e-05, %v950_v1  ;;  %v1277_v7 = vmul.f32 0.5, %v1276_v13 }
 0x2b0   : > { %v1209_v45 = vmul.f32 %v1847_v36, %v1208_v29  ;;  %v1398_v11 = vadd.f32 %v2842_v26, %v1364_v9  ;;  %v1362_v28 = vmul.f32 %v2829_v53, %v1328_v59  ;;  %v948_v6 = vmul.f32 0.010416667, %v913_v46  ;;  %vm3311_vm1 = vmor %vm1280_vm13, %vm1281_vm15 }
 0x2b1   : > { %v1257_v58 = vmul.f32 0.5, %v1256_v22  ;;  %1854 = vrsqrt.f32 %v3298_v48  ;;  %v1278_v34 = vsub.f32 1.5, %v1277_v7  ;;  %vm1260_vm2 = vweird.f32 %v3228_v61 }
 0x2b2   : > { %v1213_v20 = vsel %vm1212_vm0, %v1847_v36, %v1209_v45  ;;  %1430 = vst [vmem:[%s2333_s3 + $0xd0] sm:$0xff] %v1398_v11  ;;  %v1396_v16 = vadd.f32 %v2842_v26, %v1362_v28  ;;  %v980_v18 = vadd.f32 1e-05, %v948_v6  ;;  %vm1261_vm3 = vweird.f32 %v1851_v40 }
 0x2b3   : > { %v1326_v23 = vmul.f32 %v1213_v20, %v2736_v63  ;;  %v1258_v3 = vsub.f32 1.5, %v1257_v58  ;;  %v951_v31 = vmul.f32 0.010416667, %v919_v25  ;;  %v1279_v63 = vmul.f32 %v1849_v60, %v1278_v34  ;;  %vm1262_vm4 = vmor %vm1260_vm2, %vm1261_vm3  ;;  %v1861_v25 = vld [vmem:[#allocation8 + $0x2] ss:$0 sm:$0xff] }
 0x2b4   : > { %v1853_v0 = vpop.eup %1852  ;;  %1428 = vst [vmem:[%s2333_s3 + $0xc0] sm:$0xff] %v1396_v16  ;;  %1856 = vrsqrt.f32 %v980_v18  ;;  %vm1240_vm6 = vweird.f32 %v3290_v39  ;;  %vm1290_vm8 = vweird.f32 %v3298_v48  ;;  %vm1270_vm12 = vweird.f32 %v980_v18 }
 0x2b5   : > { %v1360_v36 = vmul.f32 %v2829_v53, %v1326_v23  ;;  %v1259_v43 = vmul.f32 %v1851_v40, %v1258_v3  ;;  %v1235_v56 = vmul.f32 %v1853_v0, %v3290_v39  ;;  %v983_v30 = vadd.f32 1e-05, %v951_v31 }
 0x2b6   : > { %v1283_v46 = vsel %vm3311_vm1, %v1849_v60, %v1279_v63  ;;  %vm1241_vm5 = vweird.f32 %v1853_v0 }
 0x2b7   : > { %v1394_v33 = vadd.f32 %v2842_v26, %v1360_v36  ;;  %v1855_v61 = vpop.eup %1854  ;;  %v1333_v15 = vmul.f32 %v1283_v46, %v2770_v19  ;;  %v1263_v49 = vsel %vm1262_vm4, %v1851_v40, %v1259_v43  ;;  %v1236_v38 = vmul.f32 %v1853_v0, %v1235_v56  ;;  %vm1242_vm7 = vmor %vm1240_vm6, %vm1241_vm5 }
 0x2b8   : > { %1858 = vrsqrt.f32 %v983_v30  ;;  %v1331_v42 = vmul.f32 %v1263_v49, %v2773_v52  ;;  %v1285_v35 = vmul.f32 %v1855_v61, %v3298_v48  ;;  %vm1291_vm9 = vweird.f32 %v1855_v61 }
 0x2b9   : > { %1426 = vst [vmem:[%s2333_s3 + $0xb0] sm:$0xff] %v1394_v33  ;;  %v1367_v2 = vmul.f32 %v2829_v53, %v1333_v15  ;;  %v1237_v12 = vmul.f32 0.5, %v1236_v38  ;;  %vm1292_vm10 = vmor %vm1290_vm8, %vm1291_vm9  ;;  %vm1300_vm15 = vweird.f32 %v983_v30 }
 0x2ba   : > { %v1857_v5 = vpop.eup %1856  ;;  %v1365_v54 = vmul.f32 %v2829_v53, %v1331_v42  ;;  %v1286_v32 = vmul.f32 %v1855_v61, %v1285_v35 }
 0x2bb   : > { %v1401_v47 = vadd.f32 %v2842_v26, %v1367_v2  ;;  %v1238_v19 = vsub.f32 1.5, %v1237_v12  ;;  %v1265_v41 = vmul.f32 %v1857_v5, %v980_v18  ;;  %vm1271_vm11 = vweird.f32 %v1857_v5 }
 0x2bc   : > { %v1399_v60 = vadd.f32 %v2842_v26, %v1365_v54  ;;  %v1287_v55 = vmul.f32 0.5, %v1286_v32  ;;  %vm1272_vm13 = vmor %vm1270_vm12, %vm1271_vm11 }
 0x2bd   : > { %1433 = vst [vmem:[%s2333_s3 + $0xe8] sm:$0xff] %v1401_v47  ;;  %v1239_v52 = vmul.f32 %v1853_v0, %v1238_v19  ;;  %v1266_v1 = vmul.f32 %v1857_v5, %v1265_v41 }
 0x2be   : > { %v1859_v24 = vpop.eup %1858  ;;  %1431 = vst [vmem:[%s2333_s3 + $0xd8] sm:$0xff] %v1399_v60  ;;  %v1288_v21 = vsub.f32 1.5, %v1287_v55 }
 0x2bf   : > { %v1295_v10 = vmul.f32 %v1859_v24, %v983_v30  ;;  %v1243_v50 = vsel %vm1242_vm7, %v1853_v0, %v1239_v52  ;;  %v1267_v14 = vmul.f32 0.5, %v1266_v1  ;;  %vm1301_vm14 = vweird.f32 %v1859_v24 }
 0x2c0   : > { %v1329_v40 = vmul.f32 %v1243_v50, %v2757_v8  ;;  %v1289_v51 = vmul.f32 %v1855_v61, %v1288_v21  ;;  %v1860_v8 = vld [vmem:[#allocation8 + $0x1] ss:$0 sm:$0xff]  ;;  %vm1302_vm0 = vmor %vm1300_vm15, %vm1301_vm14 }
 0x2c1   : > { %v1296_v4 = vmul.f32 %v1859_v24, %v1295_v10  ;;  %v1268_v62 = vsub.f32 1.5, %v1267_v14 }
 0x2c2   : > { %v1363_v39 = vmul.f32 %v2829_v53, %v1329_v40  ;;  %v1293_v29 = vsel %vm1292_vm10, %v1855_v61, %v1289_v51 }
 0x2c3   : > { %v1297_v57 = vmul.f32 0.5, %v1296_v4  ;;  %v1334_v9 = vmul.f32 %v1293_v29, %v2791_v44  ;;  %v1269_v59 = vmul.f32 %v1857_v5, %v1268_v62 }
 0x2c4   : > { %v1397_v13 = vadd.f32 %v2842_v26, %v1363_v39 }
 0x2c5   : > { %v1298_v45 = vsub.f32 1.5, %v1297_v57  ;;  %v1368_v22 = vmul.f32 %v1860_v8, %v1334_v9  ;;  %v1273_v48 = vsel %vm1272_vm13, %v1857_v5, %v1269_v59 }
 0x2c6   : > { %1429 = vst [vmem:[%s2333_s3 + $0xc8] sm:$0xff] %v1397_v13  ;;  %v1332_v53 = vmul.f32 %v1273_v48, %v2778_v17 }
 0x2c7   : > { %v1299_v11 = vmul.f32 %v1859_v24, %v1298_v45  ;;  %v1402_v44 = vadd.f32 %v2842_v26, %v1368_v22 }
 0x2c8   : > { %v1366_v28 = vmul.f32 %v1860_v8, %v1332_v53 }
 0x2c9   : > { %v1303_v7 = vsel %vm1302_vm0, %v1859_v24, %v1299_v11  ;;  %1434 = vst [vmem:[%s2333_s3 + $0xf0] sm:$0xff] %v1402_v44 }
 0x2ca   : > { %v1335_v6 = vmul.f32 %v1303_v7, %v2794_v27  ;;  %v1400_v20 = vadd.f32 %v1861_v25, %v1366_v28 }
 0x2cc   : > { %v1369_v58 = vmul.f32 %v1860_v8, %v1335_v6  ;;  %1432 = vst [vmem:[%s2333_s3 + $0xe0] sm:$0xff] %v1400_v20 }
 0x2ce   : > { %v1403_v16 = vadd.f32 %v1861_v25, %v1369_v58 }
 0x2d0   : > { %1435 = vst [vmem:[%s2333_s3 + $0xf8] sm:$0xff] %v1403_v16 }
 0x2d1 PF: > { %s3469_s21 = sld [smem:[#allocation17_spill]]  ;;  %s1449_s7 = sshll.u32 %s2333_s3, 4  ;;  %s1450_s7 = int_to_ptr.vmem [resolvable:$true] %s1449_s7 }
 0x2d2   : > { %s3471_s4 = sld [smem:[#allocation27_spill]]  ;;  %s1437_s8 = scalar_lea.sflag [#allocation5], %s260_s29 }
 0x2d7   : > { %s1596_s30 = sshll.u32 %s3469_s21, 8 }
 0x2d8   : > { %s1448_s11 = scalar_lea.hbm %s3471_s4, %s1596_s30  ;;  %s1972_s10 = scalar_lea.hbm %s3471_s4, 512 }
 0x2d9   : > { %s1451_s28 = sshll.u32 %s1448_s11, 4  ;;  %s1452_s28 = int_to_ptr.hbm [resolvable:$true] %s1451_s28 }
 0x2da   : > { %s1966_s18 = sshra.s32 %s1452_s28, 4  ;;  %s1967_s18 = int_to_ptr.hbm [resolvable:$true] %s1966_s18 }
 0x2db   : > { %s1968_s6 = scalar_lea.hbm %s1967_s18, 256  ;;  %p1973_p10 = scmp.lt.s32.totalorder %s1967_s18, %s3471_s4 }
 0x2dc   : > { %p1969_p5 = scmp.ne.s32.totalorder %s1967_s18, %s1968_s6  ;;  %p1974_p0 = scmp.lt.s32.totalorder %s1972_s10, %s1968_s6 }
 0x2de   : > { %p1970_p13 = pnand %p1969_p5, %p2226_p9  ;;  %p1975_p4 = por %p1974_p0, %p1973_p10 }
 0x2e0   : > { %p1971_p7 = pneg %p1970_p13 }
 0x2e2   : > { %p1976_p6 = pnand %p1975_p4, %p1971_p7 }
 0x2e4   : > { %1979 = shalt.err (!%p1976_p6)
}
 0x2e5   : > { %s2113_s14 = smov 128   ;;  %s2114_s20 = smov 8  }
 0x2e6   : > { %1653 = dma.vmem_to_hbm [thread:$0]  (%p2226_p9), %s1450_s7, 4096, %s1452_s28, %s1437_s8, %s2113_s14, %s2113_s14, %s2114_s20  }
 0x2e7 PF: > { %s3472_s5 = sld [smem:[#allocation14_spill]]  ;;  %p1673_p8 = scmp.ge.s32.totalorder %s2106_s25, 2 }
 0x2e9   : > { %p1667_p2 = pnand %p1673_p8, %p2231_p11 }
 0x2eb   : > { %p1668_p12 = pneg %p1667_p2 }
 0x2ed   : > { %s1466_s9 = sand.u32 1, %s3472_s5  }
 0x2ee   : > { %s1467_s3 = scalar_lea.sflag [#allocation5], %s1466_s9 }
 0x2ef   : > { %2049 = dma.done.wait (%p1668_p12), %s1467_s3, 4096  }
 0x2f0   : > { %2051 = vsyncadd (%p1668_p12), %s1467_s3, 4294963200  ;;  %s22_s25 = sadd.s32 1, %s2106_s25   ;;  %s3475_s26 = sld [smem:[#allocation15_spill]] }
 0x2f1   : > { %p3367_p3 = scmp.ge.s32.totalorder %s22_s25, 6   ;;  %s3476_s14 = sld [smem:[#allocation23_spill]] }
 0x2f2   : > { %s3477_s30 = sld [smem:[#allocation16_spill]]  ;;  %s3483_s12 = smov %s2058_s13 }
 0x2f3   : > { %s3478_s20 = sld [smem:[#allocation24_spill]]  ;;  %s3485_s15 = smov %s2070_s16 }
 0x2f4   : > { %s3479_s22 = sld [smem:[#allocation18_spill]]  ;;  %s3486_s16 = smov %s2074_s17 }
 0x2f5   : > { %s3480_s2 = sld [smem:[#allocation21_spill]]  ;;  %s3487_s17 = smov %s2298_s24 }
 0x2f6   : > { %s3481_s11 = sld [smem:[#allocation22_spill]]  ;;  %s3484_s13 = smov %s3475_s26 }
 0x2f7   : > { %s3488_s18 = smov %s2082_s19  ;;  %s3490_s21 = smov %s2098_s23 }
 0x2f8   : > { %s3489_s19 = smov %s3477_s30  ;;  %21 = sbr.rel (!%p3367_p3) target bundleno = 16 (0x10), region = 102 }
 0x2fb   : > { %s3491_s23 = smov %s3480_s2 }
 0x2fc   : > { %s3492_s24 = smov %s3481_s11 }
 0x2fd   :  { %1473 = vsyncpa [#allocation4], 1 }
 0x2fe   :  { %1475 = vsyncpa [#allocation4 + $0x1], 1 }
 0x2ff   :  { %1476 = vsyncpa [#allocation7], 1 }
 0x300   :  { %1478 = vsyncpa [#allocation7 + $0x1], 1 }
 0x301   :  { %1479 = vsyncpa [#allocation5], 1 }
 0x302   :  { %1481 = vsyncpa [#allocation5 + $0x1], 1 }

</bundles_post_ra>
